<compile_context>
chip_gen: v7x
topology: tpu7x:2x2x1
jax: 0.10.0
libtpu: 0.0.40
codegen_flags: <defaults>
</compile_context>

<pallas_src>
import functools
import math

import jax
import jax.numpy as jnp
from jax.experimental import pallas as pl

# ---------------- synthetic hyperparameters (small) ----------------
B, SL = 2, 8
# Cats enum: task_container_id=0, answered_correctly=1, user_answer=2, qhe=3
CAT_TASK_CONTAINER_ID, CAT_ANSWERED_CORRECTLY, CAT_USER_ANSWER, CAT_QHE = 0, 1, 2, 3
# Conts enum: qet=0, qet_log=1
CONT_QET, CONT_QET_LOG = 0, 1
EMB_SZS = [(20, 8), (4, 8), (6, 8), (5, 8)]   # (n_emb, emb_dim) per categorical feature
TAGS_N_EMB = 12                               # EmbeddingBag becomes (TAGS_N_EMB+1, TRF_DIM)
N_CONT = 2
TAGSF = 3
TRF_DIM, TRF_HEADS, TRF_ENC, TRF_DEC = 32, 4, 1, 1
HEAD_DIM = TRF_DIM // TRF_HEADS
FFN_DIM = TRF_DIM * 4
N_OUT = 6
OUT_PAD = 128                                 # lane-dense final store, sliced in wrapper
LN_EPS = 1e-5
CATF = len(EMB_SZS)
SLAB_W = 128                                  # parameter-slab lane width
NEG = -1e30


# ---------------- the single fused Pallas kernel ----------------
def _tutornet_kernel(feats_ref, tags_ref, masks_ref, slab_ref, out_ref, *,
                     offs, n_enc, n_dec, inv_nfeat):
    R = out_ref.shape[0]                      # B*SL rows per stream

    def P(name):                              # static slab slice (trace-time offsets)
        off, r, c = offs[name]
        return slab_ref[off:off + r, :c]

    def linear(x, name, act=None):
        y = jnp.dot(x, P(name + "_w"), preferred_element_type=jnp.float32) + P(name + "_b")
        if act == "relu":
            y = jnp.maximum(y, 0.0)
        return y

    def layer_norm(x, name):
        mu = jnp.mean(x, axis=-1, keepdims=True)
        var = jnp.mean(x * x, axis=-1, keepdims=True) - mu * mu
        return (x - mu) * jax.lax.rsqrt(var + LN_EPS) * P(name + "_g") + P(name + "_b")

    def split_heads(t):                       # (R, D) -> (H*R, HEAD_DIM), head-major rows
        return jnp.concatenate(
            [t[:, h * HEAD_DIM:(h + 1) * HEAD_DIM] for h in range(TRF_HEADS)], axis=0)

    def merge_heads(t):                       # (H*R, HEAD_DIM) -> (R, D)
        return jnp.concatenate(
            [t[h * R:(h + 1) * R, :] for h in range(TRF_HEADS)], axis=1)

    def attention(q, k, v, add_mask, out_name):
        # q,k,v: (R, D); add_mask: (H*R, H*R) additive, block-diag over heads+batches.
        # 1/sqrt(HEAD_DIM) is already folded into the packed Wq/bq.
        qs, ks, vs = split_heads(q), split_heads(k), split_heads(v)
        s = jax.lax.dot_general(qs, ks, (((1,), (1,)), ((), ())),
                                preferred_element_type=jnp.float32) + add_mask
        s = s - jnp.max(s, axis=-1, keepdims=True)
        e = jnp.exp(s)
        p = e * pl.reciprocal(jnp.sum(e, axis=-1, keepdims=True), approx=True)
        o = merge_heads(jnp.dot(p, vs, preferred_element_type=jnp.float32))
        return linear(o, out_name)

    enc_add = masks_ref[0]
    dec_add = masks_ref[1]

    # Feature mix for BOTH streams at once: mean of (4 cat Linears + tag bag + conts)
    # == (concat-features @ fused W + summed bias + tag_bag) / 6.
    mix = (jnp.dot(feats_ref[...], P("feat_w"), preferred_element_type=jnp.float32)
           + P("feat_b") + tags_ref[...]) * inv_nfeat
    x = mix[:R]                               # encoder stream
    y = mix[R:]                               # decoder stream

    # ---- encoder stack (post-norm, relu) ----
    for i in range(n_enc):
        pre = f"enc{i}_"
        qkv = linear(x, pre + "qkv")
        q, k, v = qkv[:, :TRF_DIM], qkv[:, TRF_DIM:2 * TRF_DIM], qkv[:, 2 * TRF_DIM:]
        x = layer_norm(x + attention(q, k, v, enc_add, pre + "out"), pre + "ln1")
        h = linear(x, pre + "ffn1", act="relu")
        x = layer_norm(x + linear(h, pre + "ffn2"), pre + "ln2")
    memory = layer_norm(x, "enc_norm")

    # ---- decoder stack ----
    for i in range(n_dec):
        pre = f"dec{i}_"
        qkv = linear(y, pre + "sa_qkv")
        q, k, v = qkv[:, :TRF_DIM], qkv[:, TRF_DIM:2 * TRF_DIM], qkv[:, 2 * TRF_DIM:]
        y = layer_norm(y + attention(q, k, v, dec_add, pre + "sa_out"), pre + "ln1")
        q = linear(y, pre + "ca_q")
        kv = linear(memory, pre + "ca_kv")
        k, v = kv[:, :TRF_DIM], kv[:, TRF_DIM:]
        # memory mask == src mask (same container-aware mask + same key padding)
        y = layer_norm(y + attention(q, k, v, enc_add, pre + "ca_out"), pre + "ln2")
        h = linear(y, pre + "ffn1", act="relu")
        y = layer_norm(y + linear(h, pre + "ffn2"), pre + "ln3")
    y = layer_norm(y, "dec_norm")

    out_ref[...] = linear(y, "mlp").astype(out_ref.dtype)   # (R, 128) unmasked store


# ---------------- parameter init (deterministic, synthetic) ----------------
def init_params(key):
    keys = jax.random.split(key, 256)
    ctr = [0]

    def nk():
        k = keys[ctr[0]]
        ctr[0] += 1
        return k

    def w(shape, scale=0.05):
        return jax.random.normal(nk(), shape, jnp.float32) * scale

    def renorm(tbl):  # emulate max_norm=1.0 (L2) at lookup by pre-renorming rows
        n = jnp.linalg.norm(tbl, axis=1, keepdims=True)
        return tbl / jnp.maximum(n, 1.0)

    def ln_p():
        return {"g": jnp.ones((TRF_DIM,), jnp.float32),
                "b": jnp.zeros((TRF_DIM,), jnp.float32)}

    def mha_p():
        return {"wq": w((TRF_DIM, TRF_DIM)), "bq": w((TRF_DIM,), 0.02),
                "wk": w((TRF_DIM, TRF_DIM)), "bk": w((TRF_DIM,), 0.02),
                "wv": w((TRF_DIM, TRF_DIM)), "bv": w((TRF_DIM,), 0.02),
                "wo": w((TRF_DIM, TRF_DIM)), "bo": w((TRF_DIM,), 0.02)}

    def ffn_p():
        return {"w1": w((TRF_DIM, FFN_DIM)), "b1": w((FFN_DIM,), 0.02),
                "w2": w((FFN_DIM, TRF_DIM)), "b2": w((TRF_DIM,), 0.02)}

    params = {"emb_tables": [], "emb_lin": []}
    for ni, nf in EMB_SZS:
        params["emb_tables"].append(renorm(w((ni + 1, nf), 0.5)))
        params["emb_lin"].append({"w": w((nf, TRF_DIM)), "b": w((TRF_DIM,), 0.02)})
    params["tag_table"] = renorm(w((TAGS_N_EMB + 1, TRF_DIM), 0.5))
    params["conts"] = {"w": w((N_CONT, TRF_DIM)), "b": w((TRF_DIM,), 0.02)}
    params["enc_layers"] = [{"sa": mha_p(), "ln1": ln_p(), "ffn": ffn_p(), "ln2": ln_p()}
                            for _ in range(TRF_ENC)]
    params["enc_norm"] = ln_p()
    params["dec_layers"] = [{"sa": mha_p(), "ln1": ln_p(), "ca": mha_p(), "ln2": ln_p(),
                             "ffn": ffn_p(), "ln3": ln_p()} for _ in range(TRF_DEC)]
    params["dec_norm"] = ln_p()
    params["mlp"] = {"w": w((TRF_DIM, N_OUT)), "b": w((N_OUT,), 0.02)}
    return params


# ---------------- pack params into ONE contiguous slab ----------------
def pack_params(params):
    """Returns (slab, offsets): slab is a single (rows, 128) f32 array holding every
    weight / bias / LN vector (8-row-aligned entries, column-padded to 128); offsets
    maps name -> (row_offset, rows, cols) as Python ints for static in-kernel slicing."""
    scale = 1.0 / math.sqrt(HEAD_DIM)
    rows, offs, n = [], {}, [0]

    def add(name, mat):
        mat = jnp.asarray(mat, jnp.float32)
        if mat.ndim == 1:
            mat = mat.reshape(1, -1)
        r, c = mat.shape
        rows.append(jnp.pad(mat, ((0, (-r) % 8), (0, SLAB_W - c))))
        offs[name] = (n[0], r, c)
        n[0] += rows[-1].shape[0]

    def add_lin(name, wt, bs):
        add(name + "_w", wt)
        add(name + "_b", bs)

    def add_ln(name, lp):
        add(name + "_g", lp["g"])
        add(name + "_b", lp["b"])

    def qkv_wb(mp):  # fold 1/sqrt(head_dim) into q projection
        return (jnp.concatenate([mp["wq"] * scale, mp["wk"], mp["wv"]], axis=1),
                jnp.concatenate([mp["bq"] * scale, mp["bk"], mp["bv"]], axis=0))

    # Fuse 4 per-categorical Linears + conts Linear:
    #   sum_i(e_i @ W_i + b_i) + (cont @ Wc + bc) == concat(e_i, cont) @ concat(W) + sum(b)
    feat_w = jnp.concatenate([el["w"] for el in params["emb_lin"]]
                             + [params["conts"]["w"]], axis=0)
    feat_b = sum([el["b"] for el in params["emb_lin"]]) + params["conts"]["b"]
    add_lin("feat", feat_w, feat_b)

    for i, lp in enumerate(params["enc_layers"]):
        pre = f"enc{i}_"
        add_lin(pre + "qkv", *qkv_wb(lp["sa"]))
        add_lin(pre + "out", lp["sa"]["wo"], lp["sa"]["bo"])
        add_ln(pre + "ln1", lp["ln1"])
        add_lin(pre + "ffn1", lp["ffn"]["w1"], lp["ffn"]["b1"])
        add_lin(pre + "ffn2", lp["ffn"]["w2"], lp["ffn"]["b2"])
        add_ln(pre + "ln2", lp["ln2"])
    add_ln("enc_norm", params["enc_norm"])

    for i, lp in enumerate(params["dec_layers"]):
        pre = f"dec{i}_"
        add_lin(pre + "sa_qkv", *qkv_wb(lp["sa"]))
        add_lin(pre + "sa_out", lp["sa"]["wo"], lp["sa"]["bo"])
        add_ln(pre + "ln1", lp["ln1"])
        add_lin(pre + "ca_q", lp["ca"]["wq"] * scale, lp["ca"]["bq"] * scale)
        add_lin(pre + "ca_kv",
                jnp.concatenate([lp["ca"]["wk"], lp["ca"]["wv"]], axis=1),
                jnp.concatenate([lp["ca"]["bk"], lp["ca"]["bv"]], axis=0))
        add_lin(pre + "ca_out", lp["ca"]["wo"], lp["ca"]["bo"])
        add_ln(pre + "ln2", lp["ln2"])
        add_lin(pre + "ffn1", lp["ffn"]["w1"], lp["ffn"]["b1"])
        add_lin(pre + "ffn2", lp["ffn"]["w2"], lp["ffn"]["b2"])
        add_ln(pre + "ln3", lp["ln3"])
    add_ln("dec_norm", params["dec_norm"])

    # final head, padded to 128 lanes for an unmasked output store
    add_lin("mlp",
            jnp.pad(params["mlp"]["w"], ((0, 0), (0, OUT_PAD - N_OUT))),
            jnp.pad(params["mlp"]["b"], ((0, OUT_PAD - N_OUT),)))

    return jnp.concatenate(rows, axis=0), offs


# ---------------- masks: additive, block-diag over batches AND heads ----------------
def _headed_additive_mask(mask_bss):
    """(B,S,S) bool (True == masked) -> (H*B*S, H*B*S) additive f32 mask (0 / -1e30),
    head-major rows (row = h*B*S + b*S + s), fully masked across batches and heads."""
    b, s, _ = mask_bss.shape
    base = jnp.where(mask_bss, NEG, 0.0).astype(jnp.float32)          # (B,S,S)
    eye_b = jnp.eye(b, dtype=jnp.float32)
    bd = (eye_b[:, None, :, None] * base[:, :, None, :]
          + (1.0 - eye_b)[:, None, :, None] * NEG).reshape(b * s, b * s)
    eye_h = jnp.eye(TRF_HEADS, dtype=jnp.float32)
    big = (eye_h[:, None, :, None] * bd[None, :, None, :]
           + (1.0 - eye_h)[:, None, :, None] * NEG)
    return big.reshape(TRF_HEADS * b * s, TRF_HEADS * b * s)


# ---------------- TutorNet forward ----------------
def tutornet_forward(params, x_mask, x_cat, x_cont, x_tags, x_tagw):
    b, sl, catf = x_cat.shape
    contf = x_cont.shape[2]
    tagsf = x_tags.shape[2]
    r = b * sl

    x_cat = x_cat + 1
    x_tags = x_tags + 1

    # ----- masks (JAX glue) -----
    causal = ~jnp.tril(jnp.ones((sl, sl), dtype=bool))                # True == masked
    x_tci = x_cat[..., CAT_TASK_CONTAINER_ID]                         # (b, sl)
    x_tci_s = jnp.zeros_like(x_tci).at[:, 1:].set(x_tci[:, :-1])
    kp = x_mask[:, None, :]                                           # key padding (b,1,sl)
    enc_mask = (x_tci[:, :, None] == x_tci_s[:, None, :]) | causal[None] | kp
    dec_mask = ((~(x_tci[:, :, None] == x_tci[:, None, :])) & causal[None]) | kp
    masks = jnp.stack([_headed_additive_mask(enc_mask),
                       _headed_additive_mask(dec_mask)], axis=0)      # (2, H*r, H*r)
    # memory mask == enc mask (same container mask + same key padding) -> reused.

    # ----- encoder / decoder raw features -----
    enc_cat = jnp.zeros_like(x_cat).at[:, 1:].set(x_cat[:, :-1])
    enc_cont = jnp.zeros_like(x_cont).at[:, 1:].set(x_cont[:, :-1])
    enc_tags = jnp.zeros_like(x_tags).at[:, 1:].set(x_tags[:, :-1])
    enc_tagw = jnp.zeros_like(x_tagw).at[:, 1:].set(x_tagw[:, :-1])
    dec_cat = (x_cat.at[..., CAT_ANSWERED_CORRECTLY].set(0)
                    .at[..., CAT_USER_ANSWER].set(0)
                    .at[..., CAT_QHE].set(0))
    dec_cont = x_cont.at[..., CONT_QET].set(0).at[..., CONT_QET_LOG].set(0)

    def branch_inputs(cat, cont, tg, tgw):
        cat2 = cat.reshape(r, catf)
        cont2 = cont.reshape(r, contf).astype(jnp.float32)
        tg2 = tg.reshape(r, tagsf)
        tgw2 = tgw.reshape(r, tagsf).astype(jnp.float32)
        embs = [jnp.take(params["emb_tables"][i], cat2[:, i], axis=0)   # gathers = glue
                for i in range(catf)]
        x_in = jnp.concatenate(embs + [cont2], axis=1)                  # (r, 4*8+2)
        tag_e = jnp.take(params["tag_table"], tg2, axis=0)              # EmbeddingBag gather
        tag_bag = jnp.sum(tag_e * tgw2[..., None], axis=1)              # mode='sum' + weights
        return x_in, tag_bag

    enc_x, enc_tag = branch_inputs(enc_cat, enc_cont, enc_tags, enc_tagw)
    dec_x, dec_tag = branch_inputs(dec_cat, dec_cont, x_tags, x_tagw)
    feats = jnp.concatenate([enc_x, dec_x], axis=0)                     # (2r, 34)
    tags = jnp.concatenate([enc_tag, dec_tag], axis=0)                  # (2r, D)

    # ----- single fused pallas_call: 4 operands in, 1 out -----
    slab, offs = pack_params(params)
    kernel = functools.partial(_tutornet_kernel, offs=offs,
                               n_enc=TRF_ENC, n_dec=TRF_DEC,
                               inv_nfeat=1.0 / float(catf + 2))
    out = pl.pallas_call(
        kernel,
        out_shape=jax.ShapeDtypeStruct((r, OUT_PAD), jnp.float32),
    )(feats, tags, masks, slab)
    return out[:, :N_OUT].reshape(b, sl, N_OUT)


if __name__ == "__main__":
    key = jax.random.PRNGKey(0)
    kp_, kc, kco, kt, ktw = jax.random.split(key, 5)
    params = init_params(kp_)

    kcs = jax.random.split(kc, CATF)
    cat_cols = [jax.random.randint(kcs[i], (B, SL), 0, EMB_SZS[i][0]) for i in range(CATF)]
    x_cat = jnp.stack(cat_cols, axis=-1).astype(jnp.int32)              # (B, SL, CATF)
    x_cont = jax.random.normal(kco, (B, SL, N_CONT), jnp.float32)       # (B, SL, N_CONT)
    x_tags = jax.random.randint(kt, (B, SL, TAGSF), 0, TAGS_N_EMB).astype(jnp.int32)
    x_tagw = jax.random.uniform(ktw, (B, SL, TAGSF), jnp.float32)
    x_mask = jnp.zeros((B, SL), dtype=bool)                             # no padding

    fwd = jax.jit(tutornet_forward)
    out = fwd(params, x_mask, x_cat, x_cont, x_tags, x_tagw)
    out = jax.block_until_ready(out)
    assert out.shape == (B, SL, N_OUT)
    assert bool(jnp.all(jnp.isfinite(out)))
    print("KERNEL_OK")
</pallas_src>

<mosaic_0001>
module attributes {stable_mosaic.version = 11 : i64} {
  func.func @_tutornet_kernel(%arg0: memref<32x34xf32, #tpu.memory_space<vmem>>, %arg1: memref<32x32xf32, #tpu.memory_space<vmem>>, %arg2: memref<2x64x64xf32, #tpu.memory_space<vmem>>, %arg3: memref<832x128xf32, #tpu.memory_space<vmem>>, %arg4: memref<16x128xf32, #tpu.memory_space<vmem>>) attributes {dimension_semantics = [], scalar_prefetch = 0 : i64, scratch_operands = 0 : i64, tpu.core_type = #tpu.core_type<tc>} {
    %c0 = arith.constant 0 : index
    %c0_0 = arith.constant 0 : index
    %c0_1 = arith.constant 0 : index
    %0 = vector.load %arg2[%c0, %c0_0, %c0_1] : memref<2x64x64xf32, #tpu.memory_space<vmem>>, vector<1x64x64xf32>
    %1 = vector.shape_cast %0 : vector<1x64x64xf32> to vector<64x64xf32>
    %c1 = arith.constant 1 : index
    %c0_2 = arith.constant 0 : index
    %c0_3 = arith.constant 0 : index
    %2 = vector.load %arg2[%c1, %c0_2, %c0_3] : memref<2x64x64xf32, #tpu.memory_space<vmem>>, vector<1x64x64xf32>
    %3 = vector.shape_cast %2 : vector<1x64x64xf32> to vector<64x64xf32>
    %c0_4 = arith.constant 0 : index
    %c0_5 = arith.constant 0 : index
    %4 = vector.load %arg0[%c0_4, %c0_5] : memref<32x34xf32, #tpu.memory_space<vmem>>, vector<32x34xf32>
    %c0_6 = arith.constant 0 : index
    %c0_7 = arith.constant 0 : index
    %5 = vector.load %arg3[%c0_6, %c0_7] : memref<832x128xf32, #tpu.memory_space<vmem>>, vector<34x32xf32>
    %cst = arith.constant dense<0.000000e+00> : vector<32x32xf32>
    %6 = tpu.matmul %4, %5, %cst {dimension_numbers = #tpu.dot_dimension_numbers<[1], [0], [0], [1], [0, 0, 1, 1], [], []>} : vector<32x34xf32>, vector<34x32xf32>, vector<32x32xf32> -> vector<32x32xf32>
    %c40 = arith.constant 40 : index
    %c0_8 = arith.constant 0 : index
    %7 = vector.load %arg3[%c40, %c0_8] : memref<832x128xf32, #tpu.memory_space<vmem>>, vector<1x32xf32>
    %8 = vector.broadcast %7 : vector<1x32xf32> to vector<32x32xf32>
    %9 = arith.addf %6, %8 : vector<32x32xf32>
    %c0_9 = arith.constant 0 : index
    %c0_10 = arith.constant 0 : index
    %10 = vector.load %arg1[%c0_9, %c0_10] : memref<32x32xf32, #tpu.memory_space<vmem>>, vector<32x32xf32>
    %11 = arith.addf %9, %10 : vector<32x32xf32>
    %cst_11 = arith.constant 0.166666672 : f32
    %12 = vector.broadcast %cst_11 : f32 to vector<32x32xf32>
    %13 = arith.mulf %11, %12 : vector<32x32xf32>
    %14 = vector.extract_strided_slice %13 {offsets = [0, 0], sizes = [16, 32], strides = [1, 1]} : vector<32x32xf32> to vector<16x32xf32>
    %15 = vector.extract_strided_slice %13 {offsets = [16, 0], sizes = [16, 32], strides = [1, 1]} : vector<32x32xf32> to vector<16x32xf32>
    %c48 = arith.constant 48 : index
    %c0_12 = arith.constant 0 : index
    %16 = vector.load %arg3[%c48, %c0_12] : memref<832x128xf32, #tpu.memory_space<vmem>>, vector<32x96xf32>
    %cst_13 = arith.constant dense<0.000000e+00> : vector<16x96xf32>
    %17 = tpu.matmul %14, %16, %cst_13 {dimension_numbers = #tpu.dot_dimension_numbers<[1], [0], [0], [1], [0, 0, 1, 1], [], []>} : vector<16x32xf32>, vector<32x96xf32>, vector<16x96xf32> -> vector<16x96xf32>
    %c80 = arith.constant 80 : index
    %c0_14 = arith.constant 0 : index
    %18 = vector.load %arg3[%c80, %c0_14] : memref<832x128xf32, #tpu.memory_space<vmem>>, vector<1x96xf32>
    %19 = vector.broadcast %18 : vector<1x96xf32> to vector<16x96xf32>
    %20 = arith.addf %17, %19 : vector<16x96xf32>
    %21 = vector.extract_strided_slice %20 {offsets = [0, 0], sizes = [16, 32], strides = [1, 1]} : vector<16x96xf32> to vector<16x32xf32>
    %22 = vector.extract_strided_slice %20 {offsets = [0, 32], sizes = [16, 32], strides = [1, 1]} : vector<16x96xf32> to vector<16x32xf32>
    %23 = vector.extract_strided_slice %20 {offsets = [0, 64], sizes = [16, 32], strides = [1, 1]} : vector<16x96xf32> to vector<16x32xf32>
    %24 = vector.extract_strided_slice %21 {offsets = [0, 0], sizes = [16, 8], strides = [1, 1]} : vector<16x32xf32> to vector<16x8xf32>
    %25 = vector.extract_strided_slice %21 {offsets = [0, 8], sizes = [16, 8], strides = [1, 1]} : vector<16x32xf32> to vector<16x8xf32>
    %26 = vector.extract_strided_slice %21 {offsets = [0, 16], sizes = [16, 8], strides = [1, 1]} : vector<16x32xf32> to vector<16x8xf32>
    %27 = vector.extract_strided_slice %21 {offsets = [0, 24], sizes = [16, 8], strides = [1, 1]} : vector<16x32xf32> to vector<16x8xf32>
    %28 = tpu.concatenate %24, %25, %26, %27 in 0 : vector<16x8xf32>, vector<16x8xf32>, vector<16x8xf32>, vector<16x8xf32> -> vector<64x8xf32>
    %29 = vector.extract_strided_slice %22 {offsets = [0, 0], sizes = [16, 8], strides = [1, 1]} : vector<16x32xf32> to vector<16x8xf32>
    %30 = vector.extract_strided_slice %22 {offsets = [0, 8], sizes = [16, 8], strides = [1, 1]} : vector<16x32xf32> to vector<16x8xf32>
    %31 = vector.extract_strided_slice %22 {offsets = [0, 16], sizes = [16, 8], strides = [1, 1]} : vector<16x32xf32> to vector<16x8xf32>
    %32 = vector.extract_strided_slice %22 {offsets = [0, 24], sizes = [16, 8], strides = [1, 1]} : vector<16x32xf32> to vector<16x8xf32>
    %33 = tpu.concatenate %29, %30, %31, %32 in 0 : vector<16x8xf32>, vector<16x8xf32>, vector<16x8xf32>, vector<16x8xf32> -> vector<64x8xf32>
    %34 = vector.extract_strided_slice %23 {offsets = [0, 0], sizes = [16, 8], strides = [1, 1]} : vector<16x32xf32> to vector<16x8xf32>
    %35 = vector.extract_strided_slice %23 {offsets = [0, 8], sizes = [16, 8], strides = [1, 1]} : vector<16x32xf32> to vector<16x8xf32>
    %36 = vector.extract_strided_slice %23 {offsets = [0, 16], sizes = [16, 8], strides = [1, 1]} : vector<16x32xf32> to vector<16x8xf32>
    %37 = vector.extract_strided_slice %23 {offsets = [0, 24], sizes = [16, 8], strides = [1, 1]} : vector<16x32xf32> to vector<16x8xf32>
    %38 = tpu.concatenate %34, %35, %36, %37 in 0 : vector<16x8xf32>, vector<16x8xf32>, vector<16x8xf32>, vector<16x8xf32> -> vector<64x8xf32>
    %cst_15 = arith.constant dense<0.000000e+00> : vector<64x64xf32>
    %39 = tpu.matmul %28, %33, %cst_15 {dimension_numbers = #tpu.dot_dimension_numbers<[1], [1], [0], [0], [0, 0, 1, 0], [], []>} : vector<64x8xf32>, vector<64x8xf32>, vector<64x64xf32> -> vector<64x64xf32>
    %40 = arith.addf %39, %1 : vector<64x64xf32>
    %cst_16 = arith.constant dense<0xFF800000> : vector<64xf32>
    %41 = vector.multi_reduction <maximumf>, %40, %cst_16 [1] : vector<64x64xf32> to vector<64xf32>
    %42 = vector.shape_cast %41 : vector<64xf32> to vector<64x1xf32>
    %43 = vector.broadcast %42 : vector<64x1xf32> to vector<64x64xf32>
    %44 = arith.subf %40, %43 : vector<64x64xf32>
    %45 = math.exp %44 : vector<64x64xf32>
    %cst_17 = arith.constant dense<0.000000e+00> : vector<64xf32>
    %46 = vector.multi_reduction <add>, %45, %cst_17 [1] : vector<64x64xf32> to vector<64xf32>
    %47 = vector.shape_cast %46 : vector<64xf32> to vector<64x1xf32>
    %48 = tpu.reciprocal %47 {approx = true} : vector<64x1xf32> -> vector<64x1xf32>
    %49 = vector.broadcast %48 : vector<64x1xf32> to vector<64x64xf32>
    %50 = arith.mulf %45, %49 : vector<64x64xf32>
    %cst_18 = arith.constant dense<0.000000e+00> : vector<64x8xf32>
    %51 = tpu.matmul %50, %38, %cst_18 {dimension_numbers = #tpu.dot_dimension_numbers<[1], [0], [0], [1], [0, 0, 1, 1], [], []>} : vector<64x64xf32>, vector<64x8xf32>, vector<64x8xf32> -> vector<64x8xf32>
    %52 = vector.extract_strided_slice %51 {offsets = [0, 0], sizes = [16, 8], strides = [1, 1]} : vector<64x8xf32> to vector<16x8xf32>
    %53 = vector.extract_strided_slice %51 {offsets = [16, 0], sizes = [16, 8], strides = [1, 1]} : vector<64x8xf32> to vector<16x8xf32>
    %54 = vector.extract_strided_slice %51 {offsets = [32, 0], sizes = [16, 8], strides = [1, 1]} : vector<64x8xf32> to vector<16x8xf32>
    %55 = vector.extract_strided_slice %51 {offsets = [48, 0], sizes = [16, 8], strides = [1, 1]} : vector<64x8xf32> to vector<16x8xf32>
    %56 = tpu.concatenate %52, %53, %54, %55 in 1 : vector<16x8xf32>, vector<16x8xf32>, vector<16x8xf32>, vector<16x8xf32> -> vector<16x32xf32>
    %c88 = arith.constant 88 : index
    %c0_19 = arith.constant 0 : index
    %57 = vector.load %arg3[%c88, %c0_19] : memref<832x128xf32, #tpu.memory_space<vmem>>, vector<32x32xf32>
    %cst_20 = arith.constant dense<0.000000e+00> : vector<16x32xf32>
    %58 = tpu.matmul %56, %57, %cst_20 {dimension_numbers = #tpu.dot_dimension_numbers<[1], [0], [0], [1], [0, 0, 1, 1], [], []>} : vector<16x32xf32>, vector<32x32xf32>, vector<16x32xf32> -> vector<16x32xf32>
    %c120 = arith.constant 120 : index
    %c0_21 = arith.constant 0 : index
    %59 = vector.load %arg3[%c120, %c0_21] : memref<832x128xf32, #tpu.memory_space<vmem>>, vector<1x32xf32>
    %60 = vector.broadcast %59 : vector<1x32xf32> to vector<16x32xf32>
    %61 = arith.addf %58, %60 : vector<16x32xf32>
    %62 = arith.addf %14, %61 : vector<16x32xf32>
    %cst_22 = arith.constant dense<0.000000e+00> : vector<16xf32>
    %63 = vector.multi_reduction <add>, %62, %cst_22 [1] : vector<16x32xf32> to vector<16xf32>
    %64 = vector.shape_cast %63 : vector<16xf32> to vector<16x1xf32>
    %cst_23 = arith.constant 3.200000e+01 : f32
    %65 = vector.broadcast %cst_23 : f32 to vector<16x1xf32>
    %66 = arith.divf %64, %65 : vector<16x1xf32>
    %67 = arith.mulf %62, %62 : vector<16x32xf32>
    %cst_24 = arith.constant dense<0.000000e+00> : vector<16xf32>
    %68 = vector.multi_reduction <add>, %67, %cst_24 [1] : vector<16x32xf32> to vector<16xf32>
    %69 = vector.shape_cast %68 : vector<16xf32> to vector<16x1xf32>
    %cst_25 = arith.constant 3.200000e+01 : f32
    %70 = vector.broadcast %cst_25 : f32 to vector<16x1xf32>
    %71 = arith.divf %69, %70 : vector<16x1xf32>
    %72 = arith.mulf %66, %66 : vector<16x1xf32>
    %73 = arith.subf %71, %72 : vector<16x1xf32>
    %74 = vector.broadcast %66 : vector<16x1xf32> to vector<16x32xf32>
    %75 = arith.subf %62, %74 : vector<16x32xf32>
    %cst_26 = arith.constant 9.99999974E-6 : f32
    %76 = vector.broadcast %cst_26 : f32 to vector<16x1xf32>
    %77 = arith.addf %73, %76 : vector<16x1xf32>
    %78 = math.rsqrt %77 : vector<16x1xf32>
    %79 = vector.broadcast %78 : vector<16x1xf32> to vector<16x32xf32>
    %80 = arith.mulf %75, %79 : vector<16x32xf32>
    %c128 = arith.constant 128 : index
    %c0_27 = arith.constant 0 : index
    %81 = vector.load %arg3[%c128, %c0_27] : memref<832x128xf32, #tpu.memory_space<vmem>>, vector<1x32xf32>
    %82 = vector.broadcast %81 : vector<1x32xf32> to vector<16x32xf32>
    %83 = arith.mulf %80, %82 : vector<16x32xf32>
    %c136 = arith.constant 136 : index
    %c0_28 = arith.constant 0 : index
    %84 = vector.load %arg3[%c136, %c0_28] : memref<832x128xf32, #tpu.memory_space<vmem>>, vector<1x32xf32>
    %85 = vector.broadcast %84 : vector<1x32xf32> to vector<16x32xf32>
    %86 = arith.addf %83, %85 : vector<16x32xf32>
    %c144 = arith.constant 144 : index
    %c0_29 = arith.constant 0 : index
    %87 = vector.load %arg3[%c144, %c0_29] : memref<832x128xf32, #tpu.memory_space<vmem>>, vector<32x128xf32>
    %cst_30 = arith.constant dense<0.000000e+00> : vector<16x128xf32>
    %88 = tpu.matmul %86, %87, %cst_30 {dimension_numbers = #tpu.dot_dimension_numbers<[1], [0], [0], [1], [0, 0, 1, 1], [], []>} : vector<16x32xf32>, vector<32x128xf32>, vector<16x128xf32> -> vector<16x128xf32>
    %c176 = arith.constant 176 : index
    %c0_31 = arith.constant 0 : index
    %89 = vector.load %arg3[%c176, %c0_31] : memref<832x128xf32, #tpu.memory_space<vmem>>, vector<1x128xf32>
    %90 = vector.broadcast %89 : vector<1x128xf32> to vector<16x128xf32>
    %91 = arith.addf %88, %90 : vector<16x128xf32>
    %cst_32 = arith.constant 0.000000e+00 : f32
    %92 = vector.broadcast %cst_32 : f32 to vector<16x128xf32>
    %93 = arith.maximumf %91, %92 : vector<16x128xf32>
    %c184 = arith.constant 184 : index
    %c0_33 = arith.constant 0 : index
    %94 = vector.load %arg3[%c184, %c0_33] : memref<832x128xf32, #tpu.memory_space<vmem>>, vector<128x32xf32>
    %cst_34 = arith.constant dense<0.000000e+00> : vector<16x32xf32>
    %95 = tpu.matmul %93, %94, %cst_34 {dimension_numbers = #tpu.dot_dimension_numbers<[1], [0], [0], [1], [0, 0, 1, 1], [], []>} : vector<16x128xf32>, vector<128x32xf32>, vector<16x32xf32> -> vector<16x32xf32>
    %c312 = arith.constant 312 : index
    %c0_35 = arith.constant 0 : index
    %96 = vector.load %arg3[%c312, %c0_35] : memref<832x128xf32, #tpu.memory_space<vmem>>, vector<1x32xf32>
    %97 = vector.broadcast %96 : vector<1x32xf32> to vector<16x32xf32>
    %98 = arith.addf %95, %97 : vector<16x32xf32>
    %99 = arith.addf %86, %98 : vector<16x32xf32>
    %cst_36 = arith.constant dense<0.000000e+00> : vector<16xf32>
    %100 = vector.multi_reduction <add>, %99, %cst_36 [1] : vector<16x32xf32> to vector<16xf32>
    %101 = vector.shape_cast %100 : vector<16xf32> to vector<16x1xf32>
    %cst_37 = arith.constant 3.200000e+01 : f32
    %102 = vector.broadcast %cst_37 : f32 to vector<16x1xf32>
    %103 = arith.divf %101, %102 : vector<16x1xf32>
    %104 = arith.mulf %99, %99 : vector<16x32xf32>
    %cst_38 = arith.constant dense<0.000000e+00> : vector<16xf32>
    %105 = vector.multi_reduction <add>, %104, %cst_38 [1] : vector<16x32xf32> to vector<16xf32>
    %106 = vector.shape_cast %105 : vector<16xf32> to vector<16x1xf32>
    %cst_39 = arith.constant 3.200000e+01 : f32
    %107 = vector.broadcast %cst_39 : f32 to vector<16x1xf32>
    %108 = arith.divf %106, %107 : vector<16x1xf32>
    %109 = arith.mulf %103, %103 : vector<16x1xf32>
    %110 = arith.subf %108, %109 : vector<16x1xf32>
    %111 = vector.broadcast %103 : vector<16x1xf32> to vector<16x32xf32>
    %112 = arith.subf %99, %111 : vector<16x32xf32>
    %cst_40 = arith.constant 9.99999974E-6 : f32
    %113 = vector.broadcast %cst_40 : f32 to vector<16x1xf32>
    %114 = arith.addf %110, %113 : vector<16x1xf32>
    %115 = math.rsqrt %114 : vector<16x1xf32>
    %116 = vector.broadcast %115 : vector<16x1xf32> to vector<16x32xf32>
    %117 = arith.mulf %112, %116 : vector<16x32xf32>
    %c320 = arith.constant 320 : index
    %c0_41 = arith.constant 0 : index
    %118 = vector.load %arg3[%c320, %c0_41] : memref<832x128xf32, #tpu.memory_space<vmem>>, vector<1x32xf32>
    %119 = vector.broadcast %118 : vector<1x32xf32> to vector<16x32xf32>
    %120 = arith.mulf %117, %119 : vector<16x32xf32>
    %c328 = arith.constant 328 : index
    %c0_42 = arith.constant 0 : index
    %121 = vector.load %arg3[%c328, %c0_42] : memref<832x128xf32, #tpu.memory_space<vmem>>, vector<1x32xf32>
    %122 = vector.broadcast %121 : vector<1x32xf32> to vector<16x32xf32>
    %123 = arith.addf %120, %122 : vector<16x32xf32>
    %cst_43 = arith.constant dense<0.000000e+00> : vector<16xf32>
    %124 = vector.multi_reduction <add>, %123, %cst_43 [1] : vector<16x32xf32> to vector<16xf32>
    %125 = vector.shape_cast %124 : vector<16xf32> to vector<16x1xf32>
    %cst_44 = arith.constant 3.200000e+01 : f32
    %126 = vector.broadcast %cst_44 : f32 to vector<16x1xf32>
    %127 = arith.divf %125, %126 : vector<16x1xf32>
    %128 = arith.mulf %123, %123 : vector<16x32xf32>
    %cst_45 = arith.constant dense<0.000000e+00> : vector<16xf32>
    %129 = vector.multi_reduction <add>, %128, %cst_45 [1] : vector<16x32xf32> to vector<16xf32>
    %130 = vector.shape_cast %129 : vector<16xf32> to vector<16x1xf32>
    %cst_46 = arith.constant 3.200000e+01 : f32
    %131 = vector.broadcast %cst_46 : f32 to vector<16x1xf32>
    %132 = arith.divf %130, %131 : vector<16x1xf32>
    %133 = arith.mulf %127, %127 : vector<16x1xf32>
    %134 = arith.subf %132, %133 : vector<16x1xf32>
    %135 = vector.broadcast %127 : vector<16x1xf32> to vector<16x32xf32>
    %136 = arith.subf %123, %135 : vector<16x32xf32>
    %cst_47 = arith.constant 9.99999974E-6 : f32
    %137 = vector.broadcast %cst_47 : f32 to vector<16x1xf32>
    %138 = arith.addf %134, %137 : vector<16x1xf32>
    %139 = math.rsqrt %138 : vector<16x1xf32>
    %140 = vector.broadcast %139 : vector<16x1xf32> to vector<16x32xf32>
    %141 = arith.mulf %136, %140 : vector<16x32xf32>
    %c336 = arith.constant 336 : index
    %c0_48 = arith.constant 0 : index
    %142 = vector.load %arg3[%c336, %c0_48] : memref<832x128xf32, #tpu.memory_space<vmem>>, vector<1x32xf32>
    %143 = vector.broadcast %142 : vector<1x32xf32> to vector<16x32xf32>
    %144 = arith.mulf %141, %143 : vector<16x32xf32>
    %c344 = arith.constant 344 : index
    %c0_49 = arith.constant 0 : index
    %145 = vector.load %arg3[%c344, %c0_49] : memref<832x128xf32, #tpu.memory_space<vmem>>, vector<1x32xf32>
    %146 = vector.broadcast %145 : vector<1x32xf32> to vector<16x32xf32>
    %147 = arith.addf %144, %146 : vector<16x32xf32>
    %c352 = arith.constant 352 : index
    %c0_50 = arith.constant 0 : index
    %148 = vector.load %arg3[%c352, %c0_50] : memref<832x128xf32, #tpu.memory_space<vmem>>, vector<32x96xf32>
    %cst_51 = arith.constant dense<0.000000e+00> : vector<16x96xf32>
    %149 = tpu.matmul %15, %148, %cst_51 {dimension_numbers = #tpu.dot_dimension_numbers<[1], [0], [0], [1], [0, 0, 1, 1], [], []>} : vector<16x32xf32>, vector<32x96xf32>, vector<16x96xf32> -> vector<16x96xf32>
    %c384 = arith.constant 384 : index
    %c0_52 = arith.constant 0 : index
    %150 = vector.load %arg3[%c384, %c0_52] : memref<832x128xf32, #tpu.memory_space<vmem>>, vector<1x96xf32>
    %151 = vector.broadcast %150 : vector<1x96xf32> to vector<16x96xf32>
    %152 = arith.addf %149, %151 : vector<16x96xf32>
    %153 = vector.extract_strided_slice %152 {offsets = [0, 0], sizes = [16, 32], strides = [1, 1]} : vector<16x96xf32> to vector<16x32xf32>
    %154 = vector.extract_strided_slice %152 {offsets = [0, 32], sizes = [16, 32], strides = [1, 1]} : vector<16x96xf32> to vector<16x32xf32>
    %155 = vector.extract_strided_slice %152 {offsets = [0, 64], sizes = [16, 32], strides = [1, 1]} : vector<16x96xf32> to vector<16x32xf32>
    %156 = vector.extract_strided_slice %153 {offsets = [0, 0], sizes = [16, 8], strides = [1, 1]} : vector<16x32xf32> to vector<16x8xf32>
    %157 = vector.extract_strided_slice %153 {offsets = [0, 8], sizes = [16, 8], strides = [1, 1]} : vector<16x32xf32> to vector<16x8xf32>
    %158 = vector.extract_strided_slice %153 {offsets = [0, 16], sizes = [16, 8], strides = [1, 1]} : vector<16x32xf32> to vector<16x8xf32>
    %159 = vector.extract_strided_slice %153 {offsets = [0, 24], sizes = [16, 8], strides = [1, 1]} : vector<16x32xf32> to vector<16x8xf32>
    %160 = tpu.concatenate %156, %157, %158, %159 in 0 : vector<16x8xf32>, vector<16x8xf32>, vector<16x8xf32>, vector<16x8xf32> -> vector<64x8xf32>
    %161 = vector.extract_strided_slice %154 {offsets = [0, 0], sizes = [16, 8], strides = [1, 1]} : vector<16x32xf32> to vector<16x8xf32>
    %162 = vector.extract_strided_slice %154 {offsets = [0, 8], sizes = [16, 8], strides = [1, 1]} : vector<16x32xf32> to vector<16x8xf32>
    %163 = vector.extract_strided_slice %154 {offsets = [0, 16], sizes = [16, 8], strides = [1, 1]} : vector<16x32xf32> to vector<16x8xf32>
    %164 = vector.extract_strided_slice %154 {offsets = [0, 24], sizes = [16, 8], strides = [1, 1]} : vector<16x32xf32> to vector<16x8xf32>
    %165 = tpu.concatenate %161, %162, %163, %164 in 0 : vector<16x8xf32>, vector<16x8xf32>, vector<16x8xf32>, vector<16x8xf32> -> vector<64x8xf32>
    %166 = vector.extract_strided_slice %155 {offsets = [0, 0], sizes = [16, 8], strides = [1, 1]} : vector<16x32xf32> to vector<16x8xf32>
    %167 = vector.extract_strided_slice %155 {offsets = [0, 8], sizes = [16, 8], strides = [1, 1]} : vector<16x32xf32> to vector<16x8xf32>
    %168 = vector.extract_strided_slice %155 {offsets = [0, 16], sizes = [16, 8], strides = [1, 1]} : vector<16x32xf32> to vector<16x8xf32>
    %169 = vector.extract_strided_slice %155 {offsets = [0, 24], sizes = [16, 8], strides = [1, 1]} : vector<16x32xf32> to vector<16x8xf32>
    %170 = tpu.concatenate %166, %167, %168, %169 in 0 : vector<16x8xf32>, vector<16x8xf32>, vector<16x8xf32>, vector<16x8xf32> -> vector<64x8xf32>
    %cst_53 = arith.constant dense<0.000000e+00> : vector<64x64xf32>
    %171 = tpu.matmul %160, %165, %cst_53 {dimension_numbers = #tpu.dot_dimension_numbers<[1], [1], [0], [0], [0, 0, 1, 0], [], []>} : vector<64x8xf32>, vector<64x8xf32>, vector<64x64xf32> -> vector<64x64xf32>
    %172 = arith.addf %171, %3 : vector<64x64xf32>
    %cst_54 = arith.constant dense<0xFF800000> : vector<64xf32>
    %173 = vector.multi_reduction <maximumf>, %172, %cst_54 [1] : vector<64x64xf32> to vector<64xf32>
    %174 = vector.shape_cast %173 : vector<64xf32> to vector<64x1xf32>
    %175 = vector.broadcast %174 : vector<64x1xf32> to vector<64x64xf32>
    %176 = arith.subf %172, %175 : vector<64x64xf32>
    %177 = math.exp %176 : vector<64x64xf32>
    %cst_55 = arith.constant dense<0.000000e+00> : vector<64xf32>
    %178 = vector.multi_reduction <add>, %177, %cst_55 [1] : vector<64x64xf32> to vector<64xf32>
    %179 = vector.shape_cast %178 : vector<64xf32> to vector<64x1xf32>
    %180 = tpu.reciprocal %179 {approx = true} : vector<64x1xf32> -> vector<64x1xf32>
    %181 = vector.broadcast %180 : vector<64x1xf32> to vector<64x64xf32>
    %182 = arith.mulf %177, %181 : vector<64x64xf32>
    %cst_56 = arith.constant dense<0.000000e+00> : vector<64x8xf32>
    %183 = tpu.matmul %182, %170, %cst_56 {dimension_numbers = #tpu.dot_dimension_numbers<[1], [0], [0], [1], [0, 0, 1, 1], [], []>} : vector<64x64xf32>, vector<64x8xf32>, vector<64x8xf32> -> vector<64x8xf32>
    %184 = vector.extract_strided_slice %183 {offsets = [0, 0], sizes = [16, 8], strides = [1, 1]} : vector<64x8xf32> to vector<16x8xf32>
    %185 = vector.extract_strided_slice %183 {offsets = [16, 0], sizes = [16, 8], strides = [1, 1]} : vector<64x8xf32> to vector<16x8xf32>
    %186 = vector.extract_strided_slice %183 {offsets = [32, 0], sizes = [16, 8], strides = [1, 1]} : vector<64x8xf32> to vector<16x8xf32>
    %187 = vector.extract_strided_slice %183 {offsets = [48, 0], sizes = [16, 8], strides = [1, 1]} : vector<64x8xf32> to vector<16x8xf32>
    %188 = tpu.concatenate %184, %185, %186, %187 in 1 : vector<16x8xf32>, vector<16x8xf32>, vector<16x8xf32>, vector<16x8xf32> -> vector<16x32xf32>
    %c392 = arith.constant 392 : index
    %c0_57 = arith.constant 0 : index
    %189 = vector.load %arg3[%c392, %c0_57] : memref<832x128xf32, #tpu.memory_space<vmem>>, vector<32x32xf32>
    %cst_58 = arith.constant dense<0.000000e+00> : vector<16x32xf32>
    %190 = tpu.matmul %188, %189, %cst_58 {dimension_numbers = #tpu.dot_dimension_numbers<[1], [0], [0], [1], [0, 0, 1, 1], [], []>} : vector<16x32xf32>, vector<32x32xf32>, vector<16x32xf32> -> vector<16x32xf32>
    %c424 = arith.constant 424 : index
    %c0_59 = arith.constant 0 : index
    %191 = vector.load %arg3[%c424, %c0_59] : memref<832x128xf32, #tpu.memory_space<vmem>>, vector<1x32xf32>
    %192 = vector.broadcast %191 : vector<1x32xf32> to vector<16x32xf32>
    %193 = arith.addf %190, %192 : vector<16x32xf32>
    %194 = arith.addf %15, %193 : vector<16x32xf32>
    %cst_60 = arith.constant dense<0.000000e+00> : vector<16xf32>
    %195 = vector.multi_reduction <add>, %194, %cst_60 [1] : vector<16x32xf32> to vector<16xf32>
    %196 = vector.shape_cast %195 : vector<16xf32> to vector<16x1xf32>
    %cst_61 = arith.constant 3.200000e+01 : f32
    %197 = vector.broadcast %cst_61 : f32 to vector<16x1xf32>
    %198 = arith.divf %196, %197 : vector<16x1xf32>
    %199 = arith.mulf %194, %194 : vector<16x32xf32>
    %cst_62 = arith.constant dense<0.000000e+00> : vector<16xf32>
    %200 = vector.multi_reduction <add>, %199, %cst_62 [1] : vector<16x32xf32> to vector<16xf32>
    %201 = vector.shape_cast %200 : vector<16xf32> to vector<16x1xf32>
    %cst_63 = arith.constant 3.200000e+01 : f32
    %202 = vector.broadcast %cst_63 : f32 to vector<16x1xf32>
    %203 = arith.divf %201, %202 : vector<16x1xf32>
    %204 = arith.mulf %198, %198 : vector<16x1xf32>
    %205 = arith.subf %203, %204 : vector<16x1xf32>
    %206 = vector.broadcast %198 : vector<16x1xf32> to vector<16x32xf32>
    %207 = arith.subf %194, %206 : vector<16x32xf32>
    %cst_64 = arith.constant 9.99999974E-6 : f32
    %208 = vector.broadcast %cst_64 : f32 to vector<16x1xf32>
    %209 = arith.addf %205, %208 : vector<16x1xf32>
    %210 = math.rsqrt %209 : vector<16x1xf32>
    %211 = vector.broadcast %210 : vector<16x1xf32> to vector<16x32xf32>
    %212 = arith.mulf %207, %211 : vector<16x32xf32>
    %c432 = arith.constant 432 : index
    %c0_65 = arith.constant 0 : index
    %213 = vector.load %arg3[%c432, %c0_65] : memref<832x128xf32, #tpu.memory_space<vmem>>, vector<1x32xf32>
    %214 = vector.broadcast %213 : vector<1x32xf32> to vector<16x32xf32>
    %215 = arith.mulf %212, %214 : vector<16x32xf32>
    %c440 = arith.constant 440 : index
    %c0_66 = arith.constant 0 : index
    %216 = vector.load %arg3[%c440, %c0_66] : memref<832x128xf32, #tpu.memory_space<vmem>>, vector<1x32xf32>
    %217 = vector.broadcast %216 : vector<1x32xf32> to vector<16x32xf32>
    %218 = arith.addf %215, %217 : vector<16x32xf32>
    %c448 = arith.constant 448 : index
    %c0_67 = arith.constant 0 : index
    %219 = vector.load %arg3[%c448, %c0_67] : memref<832x128xf32, #tpu.memory_space<vmem>>, vector<32x32xf32>
    %cst_68 = arith.constant dense<0.000000e+00> : vector<16x32xf32>
    %220 = tpu.matmul %218, %219, %cst_68 {dimension_numbers = #tpu.dot_dimension_numbers<[1], [0], [0], [1], [0, 0, 1, 1], [], []>} : vector<16x32xf32>, vector<32x32xf32>, vector<16x32xf32> -> vector<16x32xf32>
    %c480 = arith.constant 480 : index
    %c0_69 = arith.constant 0 : index
    %221 = vector.load %arg3[%c480, %c0_69] : memref<832x128xf32, #tpu.memory_space<vmem>>, vector<1x32xf32>
    %222 = vector.broadcast %221 : vector<1x32xf32> to vector<16x32xf32>
    %223 = arith.addf %220, %222 : vector<16x32xf32>
    %c488 = arith.constant 488 : index
    %c0_70 = arith.constant 0 : index
    %224 = vector.load %arg3[%c488, %c0_70] : memref<832x128xf32, #tpu.memory_space<vmem>>, vector<32x64xf32>
    %cst_71 = arith.constant dense<0.000000e+00> : vector<16x64xf32>
    %225 = tpu.matmul %147, %224, %cst_71 {dimension_numbers = #tpu.dot_dimension_numbers<[1], [0], [0], [1], [0, 0, 1, 1], [], []>} : vector<16x32xf32>, vector<32x64xf32>, vector<16x64xf32> -> vector<16x64xf32>
    %c520 = arith.constant 520 : index
    %c0_72 = arith.constant 0 : index
    %226 = vector.load %arg3[%c520, %c0_72] : memref<832x128xf32, #tpu.memory_space<vmem>>, vector<1x64xf32>
    %227 = vector.broadcast %226 : vector<1x64xf32> to vector<16x64xf32>
    %228 = arith.addf %225, %227 : vector<16x64xf32>
    %229 = vector.extract_strided_slice %228 {offsets = [0, 0], sizes = [16, 32], strides = [1, 1]} : vector<16x64xf32> to vector<16x32xf32>
    %230 = vector.extract_strided_slice %228 {offsets = [0, 32], sizes = [16, 32], strides = [1, 1]} : vector<16x64xf32> to vector<16x32xf32>
    %231 = vector.extract_strided_slice %223 {offsets = [0, 0], sizes = [16, 8], strides = [1, 1]} : vector<16x32xf32> to vector<16x8xf32>
    %232 = vector.extract_strided_slice %223 {offsets = [0, 8], sizes = [16, 8], strides = [1, 1]} : vector<16x32xf32> to vector<16x8xf32>
    %233 = vector.extract_strided_slice %223 {offsets = [0, 16], sizes = [16, 8], strides = [1, 1]} : vector<16x32xf32> to vector<16x8xf32>
    %234 = vector.extract_strided_slice %223 {offsets = [0, 24], sizes = [16, 8], strides = [1, 1]} : vector<16x32xf32> to vector<16x8xf32>
    %235 = tpu.concatenate %231, %232, %233, %234 in 0 : vector<16x8xf32>, vector<16x8xf32>, vector<16x8xf32>, vector<16x8xf32> -> vector<64x8xf32>
    %236 = vector.extract_strided_slice %229 {offsets = [0, 0], sizes = [16, 8], strides = [1, 1]} : vector<16x32xf32> to vector<16x8xf32>
    %237 = vector.extract_strided_slice %229 {offsets = [0, 8], sizes = [16, 8], strides = [1, 1]} : vector<16x32xf32> to vector<16x8xf32>
    %238 = vector.extract_strided_slice %229 {offsets = [0, 16], sizes = [16, 8], strides = [1, 1]} : vector<16x32xf32> to vector<16x8xf32>
    %239 = vector.extract_strided_slice %229 {offsets = [0, 24], sizes = [16, 8], strides = [1, 1]} : vector<16x32xf32> to vector<16x8xf32>
    %240 = tpu.concatenate %236, %237, %238, %239 in 0 : vector<16x8xf32>, vector<16x8xf32>, vector<16x8xf32>, vector<16x8xf32> -> vector<64x8xf32>
    %241 = vector.extract_strided_slice %230 {offsets = [0, 0], sizes = [16, 8], strides = [1, 1]} : vector<16x32xf32> to vector<16x8xf32>
    %242 = vector.extract_strided_slice %230 {offsets = [0, 8], sizes = [16, 8], strides = [1, 1]} : vector<16x32xf32> to vector<16x8xf32>
    %243 = vector.extract_strided_slice %230 {offsets = [0, 16], sizes = [16, 8], strides = [1, 1]} : vector<16x32xf32> to vector<16x8xf32>
    %244 = vector.extract_strided_slice %230 {offsets = [0, 24], sizes = [16, 8], strides = [1, 1]} : vector<16x32xf32> to vector<16x8xf32>
    %245 = tpu.concatenate %241, %242, %243, %244 in 0 : vector<16x8xf32>, vector<16x8xf32>, vector<16x8xf32>, vector<16x8xf32> -> vector<64x8xf32>
    %cst_73 = arith.constant dense<0.000000e+00> : vector<64x64xf32>
    %246 = tpu.matmul %235, %240, %cst_73 {dimension_numbers = #tpu.dot_dimension_numbers<[1], [1], [0], [0], [0, 0, 1, 0], [], []>} : vector<64x8xf32>, vector<64x8xf32>, vector<64x64xf32> -> vector<64x64xf32>
    %247 = arith.addf %246, %1 : vector<64x64xf32>
    %cst_74 = arith.constant dense<0xFF800000> : vector<64xf32>
    %248 = vector.multi_reduction <maximumf>, %247, %cst_74 [1] : vector<64x64xf32> to vector<64xf32>
    %249 = vector.shape_cast %248 : vector<64xf32> to vector<64x1xf32>
    %250 = vector.broadcast %249 : vector<64x1xf32> to vector<64x64xf32>
    %251 = arith.subf %247, %250 : vector<64x64xf32>
    %252 = math.exp %251 : vector<64x64xf32>
    %cst_75 = arith.constant dense<0.000000e+00> : vector<64xf32>
    %253 = vector.multi_reduction <add>, %252, %cst_75 [1] : vector<64x64xf32> to vector<64xf32>
    %254 = vector.shape_cast %253 : vector<64xf32> to vector<64x1xf32>
    %255 = tpu.reciprocal %254 {approx = true} : vector<64x1xf32> -> vector<64x1xf32>
    %256 = vector.broadcast %255 : vector<64x1xf32> to vector<64x64xf32>
    %257 = arith.mulf %252, %256 : vector<64x64xf32>
    %cst_76 = arith.constant dense<0.000000e+00> : vector<64x8xf32>
    %258 = tpu.matmul %257, %245, %cst_76 {dimension_numbers = #tpu.dot_dimension_numbers<[1], [0], [0], [1], [0, 0, 1, 1], [], []>} : vector<64x64xf32>, vector<64x8xf32>, vector<64x8xf32> -> vector<64x8xf32>
    %259 = vector.extract_strided_slice %258 {offsets = [0, 0], sizes = [16, 8], strides = [1, 1]} : vector<64x8xf32> to vector<16x8xf32>
    %260 = vector.extract_strided_slice %258 {offsets = [16, 0], sizes = [16, 8], strides = [1, 1]} : vector<64x8xf32> to vector<16x8xf32>
    %261 = vector.extract_strided_slice %258 {offsets = [32, 0], sizes = [16, 8], strides = [1, 1]} : vector<64x8xf32> to vector<16x8xf32>
    %262 = vector.extract_strided_slice %258 {offsets = [48, 0], sizes = [16, 8], strides = [1, 1]} : vector<64x8xf32> to vector<16x8xf32>
    %263 = tpu.concatenate %259, %260, %261, %262 in 1 : vector<16x8xf32>, vector<16x8xf32>, vector<16x8xf32>, vector<16x8xf32> -> vector<16x32xf32>
    %c528 = arith.constant 528 : index
    %c0_77 = arith.constant 0 : index
    %264 = vector.load %arg3[%c528, %c0_77] : memref<832x128xf32, #tpu.memory_space<vmem>>, vector<32x32xf32>
    %cst_78 = arith.constant dense<0.000000e+00> : vector<16x32xf32>
    %265 = tpu.matmul %263, %264, %cst_78 {dimension_numbers = #tpu.dot_dimension_numbers<[1], [0], [0], [1], [0, 0, 1, 1], [], []>} : vector<16x32xf32>, vector<32x32xf32>, vector<16x32xf32> -> vector<16x32xf32>
    %c560 = arith.constant 560 : index
    %c0_79 = arith.constant 0 : index
    %266 = vector.load %arg3[%c560, %c0_79] : memref<832x128xf32, #tpu.memory_space<vmem>>, vector<1x32xf32>
    %267 = vector.broadcast %266 : vector<1x32xf32> to vector<16x32xf32>
    %268 = arith.addf %265, %267 : vector<16x32xf32>
    %269 = arith.addf %218, %268 : vector<16x32xf32>
    %cst_80 = arith.constant dense<0.000000e+00> : vector<16xf32>
    %270 = vector.multi_reduction <add>, %269, %cst_80 [1] : vector<16x32xf32> to vector<16xf32>
    %271 = vector.shape_cast %270 : vector<16xf32> to vector<16x1xf32>
    %cst_81 = arith.constant 3.200000e+01 : f32
    %272 = vector.broadcast %cst_81 : f32 to vector<16x1xf32>
    %273 = arith.divf %271, %272 : vector<16x1xf32>
    %274 = arith.mulf %269, %269 : vector<16x32xf32>
    %cst_82 = arith.constant dense<0.000000e+00> : vector<16xf32>
    %275 = vector.multi_reduction <add>, %274, %cst_82 [1] : vector<16x32xf32> to vector<16xf32>
    %276 = vector.shape_cast %275 : vector<16xf32> to vector<16x1xf32>
    %cst_83 = arith.constant 3.200000e+01 : f32
    %277 = vector.broadcast %cst_83 : f32 to vector<16x1xf32>
    %278 = arith.divf %276, %277 : vector<16x1xf32>
    %279 = arith.mulf %273, %273 : vector<16x1xf32>
    %280 = arith.subf %278, %279 : vector<16x1xf32>
    %281 = vector.broadcast %273 : vector<16x1xf32> to vector<16x32xf32>
    %282 = arith.subf %269, %281 : vector<16x32xf32>
    %cst_84 = arith.constant 9.99999974E-6 : f32
    %283 = vector.broadcast %cst_84 : f32 to vector<16x1xf32>
    %284 = arith.addf %280, %283 : vector<16x1xf32>
    %285 = math.rsqrt %284 : vector<16x1xf32>
    %286 = vector.broadcast %285 : vector<16x1xf32> to vector<16x32xf32>
    %287 = arith.mulf %282, %286 : vector<16x32xf32>
    %c568 = arith.constant 568 : index
    %c0_85 = arith.constant 0 : index
    %288 = vector.load %arg3[%c568, %c0_85] : memref<832x128xf32, #tpu.memory_space<vmem>>, vector<1x32xf32>
    %289 = vector.broadcast %288 : vector<1x32xf32> to vector<16x32xf32>
    %290 = arith.mulf %287, %289 : vector<16x32xf32>
    %c576 = arith.constant 576 : index
    %c0_86 = arith.constant 0 : index
    %291 = vector.load %arg3[%c576, %c0_86] : memref<832x128xf32, #tpu.memory_space<vmem>>, vector<1x32xf32>
    %292 = vector.broadcast %291 : vector<1x32xf32> to vector<16x32xf32>
    %293 = arith.addf %290, %292 : vector<16x32xf32>
    %c584 = arith.constant 584 : index
    %c0_87 = arith.constant 0 : index
    %294 = vector.load %arg3[%c584, %c0_87] : memref<832x128xf32, #tpu.memory_space<vmem>>, vector<32x128xf32>
    %cst_88 = arith.constant dense<0.000000e+00> : vector<16x128xf32>
    %295 = tpu.matmul %293, %294, %cst_88 {dimension_numbers = #tpu.dot_dimension_numbers<[1], [0], [0], [1], [0, 0, 1, 1], [], []>} : vector<16x32xf32>, vector<32x128xf32>, vector<16x128xf32> -> vector<16x128xf32>
    %c616 = arith.constant 616 : index
    %c0_89 = arith.constant 0 : index
    %296 = vector.load %arg3[%c616, %c0_89] : memref<832x128xf32, #tpu.memory_space<vmem>>, vector<1x128xf32>
    %297 = vector.broadcast %296 : vector<1x128xf32> to vector<16x128xf32>
    %298 = arith.addf %295, %297 : vector<16x128xf32>
    %cst_90 = arith.constant 0.000000e+00 : f32
    %299 = vector.broadcast %cst_90 : f32 to vector<16x128xf32>
    %300 = arith.maximumf %298, %299 : vector<16x128xf32>
    %c624 = arith.constant 624 : index
    %c0_91 = arith.constant 0 : index
    %301 = vector.load %arg3[%c624, %c0_91] : memref<832x128xf32, #tpu.memory_space<vmem>>, vector<128x32xf32>
    %cst_92 = arith.constant dense<0.000000e+00> : vector<16x32xf32>
    %302 = tpu.matmul %300, %301, %cst_92 {dimension_numbers = #tpu.dot_dimension_numbers<[1], [0], [0], [1], [0, 0, 1, 1], [], []>} : vector<16x128xf32>, vector<128x32xf32>, vector<16x32xf32> -> vector<16x32xf32>
    %c752 = arith.constant 752 : index
    %c0_93 = arith.constant 0 : index
    %303 = vector.load %arg3[%c752, %c0_93] : memref<832x128xf32, #tpu.memory_space<vmem>>, vector<1x32xf32>
    %304 = vector.broadcast %303 : vector<1x32xf32> to vector<16x32xf32>
    %305 = arith.addf %302, %304 : vector<16x32xf32>
    %306 = arith.addf %293, %305 : vector<16x32xf32>
    %cst_94 = arith.constant dense<0.000000e+00> : vector<16xf32>
    %307 = vector.multi_reduction <add>, %306, %cst_94 [1] : vector<16x32xf32> to vector<16xf32>
    %308 = vector.shape_cast %307 : vector<16xf32> to vector<16x1xf32>
    %cst_95 = arith.constant 3.200000e+01 : f32
    %309 = vector.broadcast %cst_95 : f32 to vector<16x1xf32>
    %310 = arith.divf %308, %309 : vector<16x1xf32>
    %311 = arith.mulf %306, %306 : vector<16x32xf32>
    %cst_96 = arith.constant dense<0.000000e+00> : vector<16xf32>
    %312 = vector.multi_reduction <add>, %311, %cst_96 [1] : vector<16x32xf32> to vector<16xf32>
    %313 = vector.shape_cast %312 : vector<16xf32> to vector<16x1xf32>
    %cst_97 = arith.constant 3.200000e+01 : f32
    %314 = vector.broadcast %cst_97 : f32 to vector<16x1xf32>
    %315 = arith.divf %313, %314 : vector<16x1xf32>
    %316 = arith.mulf %310, %310 : vector<16x1xf32>
    %317 = arith.subf %315, %316 : vector<16x1xf32>
    %318 = vector.broadcast %310 : vector<16x1xf32> to vector<16x32xf32>
    %319 = arith.subf %306, %318 : vector<16x32xf32>
    %cst_98 = arith.constant 9.99999974E-6 : f32
    %320 = vector.broadcast %cst_98 : f32 to vector<16x1xf32>
    %321 = arith.addf %317, %320 : vector<16x1xf32>
    %322 = math.rsqrt %321 : vector<16x1xf32>
    %323 = vector.broadcast %322 : vector<16x1xf32> to vector<16x32xf32>
    %324 = arith.mulf %319, %323 : vector<16x32xf32>
    %c760 = arith.constant 760 : index
    %c0_99 = arith.constant 0 : index
    %325 = vector.load %arg3[%c760, %c0_99] : memref<832x128xf32, #tpu.memory_space<vmem>>, vector<1x32xf32>
    %326 = vector.broadcast %325 : vector<1x32xf32> to vector<16x32xf32>
    %327 = arith.mulf %324, %326 : vector<16x32xf32>
    %c768 = arith.constant 768 : index
    %c0_100 = arith.constant 0 : index
    %328 = vector.load %arg3[%c768, %c0_100] : memref<832x128xf32, #tpu.memory_space<vmem>>, vector<1x32xf32>
    %329 = vector.broadcast %328 : vector<1x32xf32> to vector<16x32xf32>
    %330 = arith.addf %327, %329 : vector<16x32xf32>
    %cst_101 = arith.constant dense<0.000000e+00> : vector<16xf32>
    %331 = vector.multi_reduction <add>, %330, %cst_101 [1] : vector<16x32xf32> to vector<16xf32>
    %332 = vector.shape_cast %331 : vector<16xf32> to vector<16x1xf32>
    %cst_102 = arith.constant 3.200000e+01 : f32
    %333 = vector.broadcast %cst_102 : f32 to vector<16x1xf32>
    %334 = arith.divf %332, %333 : vector<16x1xf32>
    %335 = arith.mulf %330, %330 : vector<16x32xf32>
    %cst_103 = arith.constant dense<0.000000e+00> : vector<16xf32>
    %336 = vector.multi_reduction <add>, %335, %cst_103 [1] : vector<16x32xf32> to vector<16xf32>
    %337 = vector.shape_cast %336 : vector<16xf32> to vector<16x1xf32>
    %cst_104 = arith.constant 3.200000e+01 : f32
    %338 = vector.broadcast %cst_104 : f32 to vector<16x1xf32>
    %339 = arith.divf %337, %338 : vector<16x1xf32>
    %340 = arith.mulf %334, %334 : vector<16x1xf32>
    %341 = arith.subf %339, %340 : vector<16x1xf32>
    %342 = vector.broadcast %334 : vector<16x1xf32> to vector<16x32xf32>
    %343 = arith.subf %330, %342 : vector<16x32xf32>
    %cst_105 = arith.constant 9.99999974E-6 : f32
    %344 = vector.broadcast %cst_105 : f32 to vector<16x1xf32>
    %345 = arith.addf %341, %344 : vector<16x1xf32>
    %346 = math.rsqrt %345 : vector<16x1xf32>
    %347 = vector.broadcast %346 : vector<16x1xf32> to vector<16x32xf32>
    %348 = arith.mulf %343, %347 : vector<16x32xf32>
    %c776 = arith.constant 776 : index
    %c0_106 = arith.constant 0 : index
    %349 = vector.load %arg3[%c776, %c0_106] : memref<832x128xf32, #tpu.memory_space<vmem>>, vector<1x32xf32>
    %350 = vector.broadcast %349 : vector<1x32xf32> to vector<16x32xf32>
    %351 = arith.mulf %348, %350 : vector<16x32xf32>
    %c784 = arith.constant 784 : index
    %c0_107 = arith.constant 0 : index
    %352 = vector.load %arg3[%c784, %c0_107] : memref<832x128xf32, #tpu.memory_space<vmem>>, vector<1x32xf32>
    %353 = vector.broadcast %352 : vector<1x32xf32> to vector<16x32xf32>
    %354 = arith.addf %351, %353 : vector<16x32xf32>
    %c792 = arith.constant 792 : index
    %c0_108 = arith.constant 0 : index
    %355 = vector.load %arg3[%c792, %c0_108] : memref<832x128xf32, #tpu.memory_space<vmem>>, vector<32x128xf32>
    %cst_109 = arith.constant dense<0.000000e+00> : vector<16x128xf32>
    %356 = tpu.matmul %354, %355, %cst_109 {dimension_numbers = #tpu.dot_dimension_numbers<[1], [0], [0], [1], [0, 0, 1, 1], [], []>} : vector<16x32xf32>, vector<32x128xf32>, vector<16x128xf32> -> vector<16x128xf32>
    %c824 = arith.constant 824 : index
    %c0_110 = arith.constant 0 : index
    %357 = vector.load %arg3[%c824, %c0_110] : memref<832x128xf32, #tpu.memory_space<vmem>>, vector<1x128xf32>
    %358 = vector.broadcast %357 : vector<1x128xf32> to vector<16x128xf32>
    %359 = arith.addf %356, %358 : vector<16x128xf32>
    %c0_111 = arith.constant 0 : index
    %c0_112 = arith.constant 0 : index
    %360 = vector.load %arg4[%c0_111, %c0_112] : memref<16x128xf32, #tpu.memory_space<vmem>>, vector<16x128xf32>
    tpu.vector_store %arg4[%c0_111, %c0_112], %359 {strides = array<i32>} : memref<16x128xf32, #tpu.memory_space<vmem>>, vector<16x128xf32>,
    return
  }
}

</mosaic_0001>

<bundles_post_ra>
// kernel: tutornet_forward.1
= control target key start
LH: loop header
LB: loop body
LE: loop exit
PB: predicated region body
PF: predicated region fallthrough
CT: control target
= control target key end

     0   :  { %vm48_vm0 = vcmask 277504   ;;  %vm61_vm1 = vcmask 1041408   ;;  %vm171_vm2 = vcmask 261120   ;;  %vm283_vm3 = vcmask 64512   ;;  %s4124_s19 = smov 112   ;;  %s4125_s20 = smov 120   ;;  %s5073_s3 = inlined_call_operand.vmem [shape: f32[832,128], index: 3, kind: input, shape index: {}]   ;;  %s5074_s0 = inlined_call_operand.vmem [shape: f32[32,34], index: 0, kind: input, shape index: {}]   ;;  %s5075_s1 = inlined_call_operand.vmem [shape: f32[32,32], index: 1, kind: input, shape index: {}]   ;;  %s5076_s2 = inlined_call_operand.vmem [shape: f32[2,64,64], index: 2, kind: input, shape index: {}]   ;;  %s5077_s4 = inlined_call_operand.vmem [shape: f32[16,128], index: 4, kind: output, shape index: {}]  }
   0x1   :  { %v38_v0 = vld [vmem:[%s5073_s3] sm:$0xff]  ;;  %v39_v1 = vld [vmem:[%s5073_s3 + $0x8] sm:$0xff]  ;;  %v40_v2 = vld [vmem:[%s5073_s3 + $0x10] sm:$0xff]  ;;  %s4126_s21 = smov 104   ;;  %s4127_s22 = smov 96   ;;  %vm421_vm5 = vcmask 523264  }
   0x2   :  { %v3597_v3 = vpack.c.bf16 %v39_v1, %v38_v0  ;;  %v41_v4 = vld [vmem:[%s5073_s3 + $0x18] sm:$0xff]  ;;  %v34_v5 = vld [vmem:[%s5074_s0] sm:$0xff]  ;;  %v35_v8 = vld [vmem:[%s5074_s0 + $0x8] sm:$0xff]  ;;  %s4128_s13 = smov 64   ;;  %s4129_s29 = smov 8   ;;  %vm689_vm6 = vcmask 130048  }
   0x3   :  { %v3601_v6 = vpack.c.bf16 %v41_v4, %v40_v2  ;;  %3243 = vmatprep.mubr.msk.f32.mxu0 %vm48_vm0, %v34_v5  ;;  %v42_v7 = vld [vmem:[%s5073_s3 + $0x20] sm:$0x3]  ;;  %v162_v9 = vld [vmem:[%s5073_s3 + $0x30] sm:$0xff]  ;;  %v163_v10 = vld [vmem:[%s5073_s3 + $0x38] sm:$0xff]  ;;  %s4130_s30 = smov 16   ;;  %s4131_s5 = smov 24  }
   0x4   :  { %3598 = vmatprep.subr.bf16.mxu0 %v3597_v3  ;;  %v3605_v11 = vpack.c.bf16 %v163_v10, %v162_v9  ;;  %v164_v12 = vld [vmem:[%s5073_s3 + $0x40] sm:$0xff]  ;;  %v165_v13 = vld [vmem:[%s5073_s3 + $0x48] sm:$0xff]  ;;  %v2914_v26 = vld [vmem:[%s5073_s3 + $0x50] ss:$0 sm:$0xff]  ;;  %vm692_vm7 = vcmask 195584  }
   0x5   :  { %3600 = vmatpush3.bf16.msra.mxu0 %v3597_v3  ;;  %v3609_v14 = vpack.c.bf16 %v165_v13, %v164_v12  ;;  %v4195_v15 = vld [vmem:[%s5073_s3 + $0x28] ss:$0 sm:$0xff]  ;;  %v150_v20 = vld [vmem:[%s5075_s1] sm:$0xff]  ;;  %vm4241_vm4 = vmpackc.low %vm283_vm3, %vm283_vm3 }
   0x6   :  { %3602 = vmatprep.subr.bf16.mxu0 %v3601_v6  ;;  %3606 = vmatprep.subr.bf16.mxu1 %v3605_v11  ;;  %v151_v17 = vld [vmem:[%s5075_s1 + $0x8] sm:$0xff]  ;;  %v17_v59 = vld [vmem:[%s5076_s2] sm:$0xff]  ;;  %v19_v1 = vld [vmem:[%s5076_s2 + $0x10] sm:$0xff] }
   0x7   :  { %3608 = vmatpush3.bf16.msra.mxu1 %v3605_v11  ;;  %v18_v58 = vld [vmem:[%s5076_s2 + $0x8] sm:$0xff]  ;;  %v20_v4 = vld [vmem:[%s5076_s2 + $0x18] sm:$0xff] }
   0x8   :  { %3610 = vmatprep.subr.bf16.mxu1 %v3609_v14  ;;  %v22_v11 = vld [vmem:[%s5076_s2 + $0x28] sm:$0xff] }
   0x9   :  { %3604 = vmatpush3.bf16.msra.mxu0 %v3601_v6 }
   0xa   :  { %3241 = vmatprep.subr.msk.mxu0 %vm61_vm1, %v42_v7 }
   0xb   :  { %3612 = vmatpush3.bf16.msra.mxu1 %v3609_v14  ;;  %v23_v14 = vld [vmem:[%s5076_s2 + $0x30] sm:$0xff] }
   0xd   :  { %3242 = vmatpush3.msk.msra.mxu0 %vm61_vm1, %v42_v7  ;;  %v21_v7 = vld [vmem:[%s5076_s2 + $0x20] sm:$0xff] }
   0xe   :  { %3244 = vmatmul.mubr.msk.f32.vlgmr.msra.gmra.mrb[0].mxu0 %vm48_vm0, %v35_v8 }
  0xe1   :  { %v3245_v16 = vpop.f32.mrb[0].mxu0 }
  0xe2   :  { %v137_v18 = vadd.f32 %v3245_v16, %v4195_v15  ;;  %v131_v19 = vpop.f32.mrb[1].mxu0 }
  0xe3   :  { %v132_v21 = vadd.f32 %v4195_v15, %v131_v19 }
  0xe4   :  { %v155_v22 = vadd.f32 %v151_v17, %v137_v18 }
  0xe5   :  { %v154_v23 = vadd.f32 %v150_v20, %v132_v21  ;;  %v24_v20 = vld [vmem:[%s5076_s2 + $0x38] sm:$0xff] }
  0xe6   :  { %v4207_v25 = vmul.f32 0.16666667, %v155_v22 }
  0xe7   :  { %v4205_v24 = vmul.f32 0.16666667, %v154_v23 }
  0xe9   :  { %3257 = vmatprep.mubr.msk.f32.mxu1 %vm171_vm2, %v4205_v24 }
  0xea   :  { %3258 = vmatmul.mubr.msk.f32.vlgmr.msra.gmra.mrb[0].mxu1 %vm171_vm2, %v4207_v25 }
 0x1bd   :  { %v3259_v27 = vpop.f32.mrb[0].mxu1 }
 0x1be   :  { %v244_v28 = vpop.f32.mrb[1].mxu1  ;;  %v250_v30 = vadd.f32 %v3259_v27, %v2914_v26 }
 0x1bf   :  { %v245_v29 = vadd.f32 %v2914_v26, %v244_v28 }
 0x1c1   :  { %259 = vrot.lane.b32.xlu1 %v245_v29, %s4124_s19  ;;  %255 = vrot.lane.b32.xlu0 %v245_v29, %s4125_s20  ;;  %v4223_v31 = vpack.i.bf16 %v250_v30, %v245_v29 }
 0x1c2   :  { %3276 = vmatprep.mubr.msk.f32.mxu1 %vm283_vm3, %v245_v29 }
 0x1c5   :  { %261 = vrot.lane.b32.xlu1 %v250_v30, %s4124_s19  ;;  %257 = vrot.lane.b32.xlu0 %v250_v30, %s4125_s20 }
 0x1c9   :  { %265 = vrot.lane.b32.xlu1 %v250_v30, %s4126_s21  ;;  %263 = vrot.lane.b32.xlu0 %v245_v29, %s4126_s21 }
 0x1cd   :  { %3878 = vrot.lane.b32.xlu0 %v4223_v31, %s4127_s22 }
 0x233   :  { %v260_v32 = vpop.permute.xlu1 %259  ;;  %v256_v33 = vpop.permute.xlu0 %255 }
 0x237   :  { %v262_v34 = vpop.permute.xlu1 %261  ;;  %v258_v35 = vpop.permute.xlu0 %257 }
 0x238   :  { %v4227_v36 = vpack.i.bf16 %v262_v34, %v260_v32  ;;  %v4229_v37 = vpack.i.bf16 %v258_v35, %v256_v33 }
 0x23a   :  { %3888 = vrot.lane.b32.xlu0 %v4227_v36, %s4127_s22  ;;  %3883 = vrot.lane.b32.xlu1 %v4229_v37, %s4127_s22 }
 0x23b   :  { %v266_v38 = vpop.permute.xlu1 %265  ;;  %v264_v39 = vpop.permute.xlu0 %263 }
 0x23c   :  { %v4235_v40 = vpack.i.bf16 %v266_v38, %v264_v39 }
 0x23e   :  { %3893 = vrot.lane.b32.xlu1 %v4235_v40, %s4127_s22 }
 0x23f   :  { %v3879_v41 = vpop.permute.xlu0 %3878 }
 0x240   :  { %v3881_v42 = vunpack.i.h.bf16 %v3879_v41  ;;  %v3880_v43 = vunpack.i.l.bf16 %v3879_v41 }
 0x242   :  { %v3613_v45 = vpack.c.bf16 %v3881_v42, %v3880_v43 }
 0x244   :  { %3615 = vmatprep.subr.msk.bf16.mxu1 %vm4241_vm4, %v3613_v45 }
 0x245   :  { %3618 = vmatpush3.bf16.xpose.msk.msra.mxu1 %vm4241_vm4, %v3613_v45 }
 0x2ac   :  { %v3884_v46 = vpop.permute.xlu1 %3883  ;;  %v3889_v47 = vpop.permute.xlu0 %3888 }
 0x2ad   :  { %v3886_v48 = vunpack.i.h.bf16 %v3884_v46  ;;  %v3885_v49 = vunpack.i.l.bf16 %v3884_v46  ;;  %v3891_v50 = vunpack.i.h.bf16 %v3889_v47  ;;  %v3890_v51 = vunpack.i.l.bf16 %v3889_v47 }
 0x2af   :  { %v3619_v52 = vpack.c.bf16 %v3886_v48, %v3885_v49  ;;  %v3625_v53 = vpack.c.bf16 %v3891_v50, %v3890_v51 }
 0x2b0   :  { %v3894_v54 = vpop.permute.xlu1 %3893 }
 0x2b1   :  { %3621 = vmatprep.subr.msk.bf16.mxu1 %vm4241_vm4, %v3619_v52  ;;  %v3896_v55 = vunpack.i.h.bf16 %v3894_v54  ;;  %v3895_v56 = vunpack.i.l.bf16 %v3894_v54 }
 0x2b2   :  { %3624 = vmatpush3.bf16.xpose.msk.msra.mxu1 %vm4241_vm4, %v3619_v52 }
 0x2b3   :  { %3627 = vmatprep.subr.msk.bf16.mxu1 %vm4241_vm4, %v3625_v53  ;;  %v3631_v57 = vpack.c.bf16 %v3896_v55, %v3895_v56 }
 0x2ba   :  { %3630 = vmatpush3.bf16.xpose.msk.msra.mxu1 %vm4241_vm4, %v3625_v53 }
 0x2bb   :  { %3633 = vmatprep.subr.msk.bf16.mxu1 %vm4241_vm4, %v3631_v57 }
 0x2c2   :  { %3636 = vmatpush3.bf16.xpose.msk.msra.mxu1 %vm4241_vm4, %v3631_v57 }
 0x2c9   :  { %3277 = vmatmul.mubr.msk.f32.vlgmr.msra.gmra.mrb[2].mxu1 %vm283_vm3, %v250_v30 }
 0x2ca   :  { %3279 = vmatprep.mubr.msk.f32.mxu1 %vm283_vm3, %v256_v33 }
 0x2cd   :  { %3280 = vmatmul.mubr.msk.f32.gmra.mrb[4].mxu1 %vm283_vm3, %v258_v35 }
 0x2ce   :  { %3282 = vmatprep.mubr.msk.f32.mxu1 %vm283_vm3, %v260_v32 }
 0x2d1   :  { %3283 = vmatmul.mubr.msk.f32.gmra.mrb[6].mxu1 %vm283_vm3, %v262_v34 }
 0x2d2   :  { %3285 = vmatprep.mubr.msk.f32.mxu1 %vm283_vm3, %v264_v39 }
 0x2d5   :  { %3286 = vmatmul.mubr.msk.f32.gmra.mrb[8].mxu1 %vm283_vm3, %v266_v38 }
 0x39c   :  { %v3278_v60 = vpop.f32.mrb[2].mxu1 }
 0x39d   :  { %v388_v61 = vadd.f32 %v3278_v60, %v18_v58  ;;  %v382_v62 = vpop.f32.mrb[3].mxu1 }
 0x39e   :  { %v383_v63 = vadd.f32 %v382_v62, %v17_v59 }
 0x39f   :  { %v425_v0 = vsel %vm421_vm5, %v388_v61, -inf }
 0x3a0   :  { %426 = vmax.xlane.f32.xlu1 %v425_v0  ;;  %v3281_v2 = vpop.f32.mrb[4].mxu1  ;;  %v422_v3 = vsel %vm421_vm5, %v383_v63, -inf }
 0x3a1   :  { %v392_v5 = vpop.f32.mrb[5].mxu1  ;;  %423 = vmax.xlane.f32.xlu0 %v422_v3  ;;  %v398_v8 = vadd.f32 %v3281_v2, %v20_v4 }
 0x3a2   :  { %v393_v6 = vadd.f32 %v392_v5, %v19_v1 }
 0x3a3   :  { %v431_v19 = vsel %vm421_vm5, %v398_v8, -inf }
 0x3a4   :  { %v3284_v9 = vpop.f32.mrb[6].mxu1  ;;  %v428_v10 = vsel %vm421_vm5, %v393_v6, -inf }
 0x3a5   :  { %v402_v12 = vpop.f32.mrb[7].mxu1  ;;  %429 = vmax.xlane.f32.xlu0 %v428_v10  ;;  %v408_v16 = vadd.f32 %v3284_v9, %v22_v11 }
 0x3a6   :  { %v403_v13 = vadd.f32 %v402_v12, %v21_v7 }
 0x3a7   :  { %v437_v27 = vsel %vm421_vm5, %v408_v16, -inf }
 0x3a8   :  { %v3287_v17 = vpop.f32.mrb[8].mxu1  ;;  %v434_v18 = vsel %vm421_vm5, %v403_v13, -inf }
 0x3a9   :  { %v412_v21 = vpop.f32.mrb[9].mxu1  ;;  %435 = vmax.xlane.f32.xlu1 %v434_v18  ;;  %432 = vmax.xlane.f32.xlu0 %v431_v19  ;;  %v418_v23 = vadd.f32 %v3287_v17, %v24_v20 }
 0x3aa   :  { %v413_v22 = vadd.f32 %v412_v21, %v23_v14  ;;  %v37_v14 = vld [vmem:[%s5074_s0 + $0x18] sm:$0xff] }
 0x3ab   :  { %v443_v28 = vsel %vm421_vm5, %v418_v23, -inf }
 0x3ac   :  { %v440_v26 = vsel %vm421_vm5, %v413_v22, -inf }
 0x3ad   :  { %441 = vmax.xlane.f32.xlu1 %v440_v26  ;;  %438 = vmax.xlane.f32.xlu0 %v437_v27 }
 0x3b1   :  { %444 = vmax.xlane.f32.xlu0 %v443_v28 }
 0x3be   :  { %3898 = vrot.lane.b32.xlu1 %v4223_v31, %s4128_s13 }
 0x42d   :  { %v427_v29 = vpop.xlane.xlu1 %426 }
 0x42e   :  { %v447_v30 = vsub.f32 %v388_v61, %v427_v29  ;;  %v424_v32 = vpop.xlane.xlu0 %423 }
 0x42f   :  { %v446_v33 = vsub.f32 %v383_v63, %v424_v32 }
 0x430   :  { %v456_v34 = vmul.f32 1.442695, %v447_v30 }
 0x431   :  { %v454_v35 = vmul.f32 1.442695, %v446_v33 }
 0x432   :  { %3992 = vpow2.f32 %v456_v34  ;;  %v430_v38 = vpop.xlane.xlu0 %429 }
 0x433   :  { %3994 = vpow2.f32 %v454_v35  ;;  %v448_v39 = vsub.f32 %v393_v6, %v430_v38 }
 0x435   :  { %v458_v41 = vmul.f32 1.442695, %v448_v39 }
 0x436   :  { %v436_v42 = vpop.xlane.xlu1 %435  ;;  %v433_v43 = vpop.xlane.xlu0 %432 }
 0x437   :  { %3996 = vpow2.f32 %v458_v41  ;;  %v450_v45 = vsub.f32 %v403_v13, %v436_v42  ;;  %v449_v46 = vsub.f32 %v398_v8, %v433_v43  ;;  %v36_v13 = vld [vmem:[%s5074_s0 + $0x10] sm:$0xff] }
 0x438   :  { %3246 = vmatprep.mubr.msk.f32.mxu0 %vm48_vm0, %v36_v13 }
 0x439   :  { %v462_v47 = vmul.f32 1.442695, %v450_v45  ;;  %v460_v48 = vmul.f32 1.442695, %v449_v46  ;;  %3247 = vmatmul.mubr.msk.f32.gmra.mrb[2].mxu0 %vm48_vm0, %v37_v14 }
 0x43a   :  { %v442_v49 = vpop.xlane.xlu1 %441  ;;  %v439_v31 = vpop.xlane.xlu0 %438 }
 0x43b   :  { %3998 = vpow2.f32 %v462_v47  ;;  %v451_v50 = vsub.f32 %v408_v16, %v439_v31  ;;  %v452_v55 = vsub.f32 %v413_v22, %v442_v49 }
 0x43c   :  { %v4302_v51 = vpop.eup %3992  ;;  %4000 = vpow2.f32 %v460_v48 }
 0x43d   :  { %v3995_v52 = vpop.eup %3994  ;;  %v464_v53 = vmul.f32 1.442695, %v451_v50  ;;  %v473_v54 = vsel %vm421_vm5, %v4302_v51, 0.0  ;;  %v466_v1 = vmul.f32 1.442695, %v452_v55 }
 0x43e   :  { %v3899_v56 = vpop.permute.xlu1 %3898  ;;  %474 = vadd.xlane.f32.xlu0 %v473_v54  ;;  %v445_v57 = vpop.xlane.xlu0 %444  ;;  %v470_v58 = vsel %vm421_vm5, %v3995_v52, 0.0 }
 0x43f   :  { %v3901_v59 = vunpack.i.h.bf16 %v3899_v56  ;;  %v3900_v60 = vunpack.i.l.bf16 %v3899_v56  ;;  %v453_v61 = vsub.f32 %v418_v23, %v445_v57  ;;  %471 = vadd.xlane.f32.xlu1 %v470_v58  ;;  %4002 = vpow2.f32 %v464_v53  ;;  %v695_v57 = vld [vmem:[%s5073_s3 + $0x58] sm:$0xff]  ;;  %v696_v58 = vld [vmem:[%s5073_s3 + $0x60] sm:$0xff] }
 0x441   :  { %v4307_v62 = vpop.eup %3996  ;;  %v468_v63 = vmul.f32 1.442695, %v453_v61  ;;  %v3637_v0 = vpack.c.bf16 %v3901_v59, %v3900_v60  ;;  %v3653_v59 = vpack.c.bf16 %v696_v58, %v695_v57  ;;  %v697_v60 = vld [vmem:[%s5073_s3 + $0x68] sm:$0xff]  ;;  %v698_v61 = vld [vmem:[%s5073_s3 + $0x70] sm:$0xff] }
 0x442   :  { %v476_v2 = vsel %vm421_vm5, %v4307_v62, 0.0  ;;  %v934_v57 = vld [vmem:[%s5073_s3 + $0x108] sm:$0xff]  ;;  %v935_v58 = vld [vmem:[%s5073_s3 + $0x110] sm:$0xff] }
 0x443   :  { %4004 = vpow2.f32 %v468_v63  ;;  %3638 = vmatprep.subr.bf16.mxu0 %v3637_v0  ;;  %477 = vadd.xlane.f32.xlu1 %v476_v2 }
 0x444   :  { %3640 = vmatpush3.bf16.msra.mxu0 %v3637_v0  ;;  %4006 = vpow2.f32 %v466_v1 }
 0x445   :  { %v4311_v3 = vpop.eup %3998 }
 0x446   :  { %v4313_v4 = vpop.eup %4000  ;;  %v482_v5 = vsel %vm421_vm5, %v4311_v3, 0.0 }
 0x447   :  { %483 = vadd.xlane.f32.xlu1 %v482_v5  ;;  %v479_v6 = vsel %vm421_vm5, %v4313_v4, 0.0 }
 0x448   :  { %480 = vadd.xlane.f32.xlu0 %v479_v6 }
 0x449   :  { %v4319_v7 = vpop.eup %4002 }
 0x44a   :  { %v485_v8 = vsel %vm421_vm5, %v4319_v7, 0.0 }
 0x44c   :  { %486 = vadd.xlane.f32.xlu0 %v485_v8 }
 0x44d   :  { %v4323_v9 = vpop.eup %4004 }
 0x44e   :  { %v491_v10 = vsel %vm421_vm5, %v4323_v9, 0.0  ;;  %v4327_v11 = vpop.eup %4006 }
 0x44f   :  { %v488_v12 = vsel %vm421_vm5, %v4327_v11, 0.0 }
 0x450   :  { %492 = vadd.xlane.f32.xlu0 %v491_v10 }
 0x454   :  { %489 = vadd.xlane.f32.xlu0 %v488_v12 }
 0x458   :  { %3908 = vrot.lane.b32.xlu1 %v4227_v36, %s4128_s13 }
 0x45c   :  { %3913 = vrot.lane.b32.xlu1 %v4235_v40, %s4128_s13 }
 0x46a   :  { %3903 = vrot.lane.b32.xlu0 %v4229_v37, %s4128_s13 }
 0x4cb   :  { %v475_v17 = vpop.xlane.xlu0 %474 }
 0x4cc   :  { %v472_v16 = vpop.xlane.xlu1 %471 }
 0x4cd   :  { %4008 = vrcp.f32 %v472_v16 }
 0x4ce   :  { %4010 = vrcp.f32 %v475_v17 }
 0x4d0   :  { %v478_v18 = vpop.xlane.xlu1 %477 }
 0x4d1   :  { %4012 = vrcp.f32 %v478_v18 }
 0x4d4   :  { %v484_v22 = vpop.xlane.xlu1 %483 }
 0x4d5   :  { %v481_v19 = vpop.xlane.xlu0 %480 }
 0x4d6   :  { %4014 = vrcp.f32 %v481_v19 }
 0x4d7   :  { %v4009_v36 = vpop.eup %4008  ;;  %4016 = vrcp.f32 %v484_v22 }
 0x4d8   :  { %v502_v20 = vmul.f32 %v4009_v36, %v3995_v52  ;;  %v3909_v26 = vpop.permute.xlu1 %3908  ;;  %v4011_v41 = vpop.eup %4010  ;;  %v2941_v36 = vld [vmem:[%s5073_s3 + $0x78] ss:$0 sm:$0xff] }
 0x4d9   :  { %v487_v21 = vpop.xlane.xlu0 %486  ;;  %v3911_v29 = vunpack.i.h.bf16 %v3909_v26  ;;  %v3910_v40 = vunpack.i.l.bf16 %v3909_v26  ;;  %v503_v43 = vmul.f32 %v4011_v41, %v4302_v51  ;;  %v925_v41 = vld [vmem:[%s5073_s3 + $0xc0] sm:$0xff] }
 0x4da   :  { %3304 = vmatprep.mubr.msk.f32.mxu0 %vm421_vm5, %v502_v20  ;;  %4018 = vrcp.f32 %v487_v21 }
 0x4db   :  { %v3645_v38 = vpack.c.bf16 %v3911_v29, %v3910_v40  ;;  %v4013_v42 = vpop.eup %4012 }
 0x4dc   :  { %v3914_v37 = vpop.permute.xlu1 %3913  ;;  %v504_v46 = vmul.f32 %v4013_v42, %v4307_v62  ;;  %v3657_v62 = vpack.c.bf16 %v698_v61, %v697_v60  ;;  %v926_v42 = vld [vmem:[%s5073_s3 + $0xc8] sm:$0xff]  ;;  %v936_v60 = vld [vmem:[%s5073_s3 + $0x118] sm:$0xff]  ;;  %v937_v61 = vld [vmem:[%s5073_s3 + $0x120] sm:$0xff] }
 0x4dd   :  { %v493_v23 = vpop.xlane.xlu0 %492  ;;  %v3916_v34 = vunpack.i.h.bf16 %v3914_v37  ;;  %v3915_v35 = vunpack.i.l.bf16 %v3914_v37  ;;  %v833_v37 = vld [vmem:[%s5073_s3 + $0x98] sm:$0xff] }
 0x4df   :  { %v3649_v39 = vpack.c.bf16 %v3916_v34, %v3915_v35  ;;  %v835_v35 = vld [vmem:[%s5073_s3 + $0xa8] sm:$0xff] }
 0x4e0   :  { %v4015_v45 = vpop.eup %4014 }
 0x4e1   :  { %v490_v27 = vpop.xlane.xlu0 %489  ;;  %v4017_v47 = vpop.eup %4016  ;;  %v505_v48 = vmul.f32 %v4015_v45, %v4313_v4  ;;  %v927_v45 = vld [vmem:[%s5073_s3 + $0xd0] sm:$0xff] }
 0x4e2   :  { %4020 = vrcp.f32 %v490_v27  ;;  %v506_v31 = vmul.f32 %v4017_v47, %v4311_v3  ;;  %v928_v47 = vld [vmem:[%s5073_s3 + $0xd8] sm:$0xff] }
 0x4e3   :  { %4022 = vrcp.f32 %v493_v23 }
 0x4e4   :  { %v4019_v49 = vpop.eup %4018 }
 0x4e5   :  { %v3904_v28 = vpop.permute.xlu0 %3903  ;;  %v507_v51 = vmul.f32 %v4019_v49, %v4319_v7 }
 0x4e6   :  { %v3906_v30 = vunpack.i.h.bf16 %v3904_v28  ;;  %v3905_v32 = vunpack.i.l.bf16 %v3904_v28 }
 0x4e8   :  { %v3641_v33 = vpack.c.bf16 %v3906_v30, %v3905_v32  ;;  %v832_v32 = vld [vmem:[%s5073_s3 + $0x90] sm:$0xff] }
 0x4e9   :  { %v3661_v34 = vpack.c.bf16 %v833_v37, %v832_v32  ;;  %v2946_v32 = vld [vmem:[%s5073_s3 + $0xb0] ss:$0 sm:$0xff] }
 0x4ea   :  { %3642 = vmatprep.subr.bf16.mxu0 %v3641_v33  ;;  %v152_v37 = vld [vmem:[%s5075_s1 + $0x10] sm:$0xff] }
 0x4eb   :  { %3644 = vmatpush3.bf16.msra.mxu0 %v3641_v33  ;;  %v834_v33 = vld [vmem:[%s5073_s3 + $0xa0] sm:$0xff] }
 0x4ec   :  { %3646 = vmatprep.subr.bf16.mxu0 %v3645_v38  ;;  %v4021_v50 = vpop.eup %4020 }
 0x4ed   :  { %v4023_v52 = vpop.eup %4022  ;;  %v508_v53 = vmul.f32 %v4021_v50, %v4327_v11  ;;  %v931_v50 = vld [vmem:[%s5073_s3 + $0xf0] sm:$0xff] }
 0x4ee   :  { %v509_v54 = vmul.f32 %v4023_v52, %v4323_v9  ;;  %v932_v52 = vld [vmem:[%s5073_s3 + $0xf8] sm:$0xff] }
 0x4ef   :  { %3648 = vmatpush3.bf16.msra.mxu0 %v3645_v38  ;;  %v3665_v38 = vpack.c.bf16 %v835_v35, %v834_v33 }
 0x4f0   :  { %3650 = vmatprep.subr.bf16.mxu0 %v3649_v39 }
 0x4f3   :  { %3652 = vmatpush3.bf16.msra.mxu0 %v3649_v39  ;;  %v924_v39 = vld [vmem:[%s5073_s3 + $0xb8] sm:$0xff] }
 0x4f4   :  { %3654 = vmatprep.subr.bf16.mxu0 %v3653_v59 }
 0x4f6   :  { %3305 = vmatmul.mubr.msk.f32.vlgmr.msra.gmra.mrb[4].mxu0 %vm421_vm5, %v503_v43  ;;  %v3669_v43 = vpack.c.bf16 %v925_v41, %v924_v39  ;;  %v1112_v41 = vld [vmem:[%s5073_s3 + $0x170] sm:$0xff] }
 0x4f7   :  { %3307 = vmatprep.mubr.msk.f32.mxu0 %vm421_vm5, %v504_v46  ;;  %3656 = vmatpush3.bf16.msra.mxu0 %v3653_v59  ;;  %v3673_v46 = vpack.c.bf16 %v927_v45, %v926_v42  ;;  %v3689_v59 = vpack.c.bf16 %v935_v58, %v934_v57 }
 0x4f8   :  { %3658 = vmatprep.subr.bf16.mxu0 %v3657_v62  ;;  %3670 = vmatprep.subr.bf16.mxu1 %v3669_v43 }
 0x4f9   :  { %3672 = vmatpush3.bf16.msra.mxu1 %v3669_v43 }
 0x4fa   :  { %3308 = vmatmul.mubr.msk.f32.gmra.mrb[6].mxu0 %vm421_vm5, %v505_v48  ;;  %v929_v48 = vld [vmem:[%s5073_s3 + $0xe0] sm:$0xff]  ;;  %3674 = vmatprep.subr.bf16.mxu1 %v3673_v46 }
 0x4fb   :  { %3310 = vmatprep.mubr.msk.f32.mxu0 %vm421_vm5, %v506_v31  ;;  %3660 = vmatpush3.bf16.msra.mxu0 %v3657_v62  ;;  %v3677_v49 = vpack.c.bf16 %v929_v48, %v928_v47  ;;  %v930_v31 = vld [vmem:[%s5073_s3 + $0xe8] sm:$0xff]  ;;  %v3693_v62 = vpack.c.bf16 %v937_v61, %v936_v60  ;;  %v153_v47 = vld [vmem:[%s5075_s1 + $0x18] sm:$0xff] }
 0x4fc   :  { %3662 = vmatprep.subr.bf16.mxu0 %v3661_v34 }
 0x4fd   :  { %3676 = vmatpush3.bf16.msra.mxu1 %v3673_v46 }
 0x4fe   :  { %3311 = vmatmul.mubr.msk.f32.gmra.mrb[8].mxu0 %vm421_vm5, %v507_v51  ;;  %3678 = vmatprep.subr.bf16.mxu1 %v3677_v49  ;;  %v3681_v51 = vpack.c.bf16 %v931_v50, %v930_v31  ;;  %v2954_v50 = vld [vmem:[%s5073_s3 + $0x180] ss:$0 sm:$0xff] }
 0x4ff   :  { %3313 = vmatprep.mubr.msk.f32.mxu0 %vm421_vm5, %v508_v53  ;;  %v933_v53 = vld [vmem:[%s5073_s3 + $0x100] sm:$0xff] }
 0x501   :  { %3680 = vmatpush3.bf16.msra.mxu1 %v3677_v49 }
 0x502   :  { %3314 = vmatmul.mubr.msk.f32.gmra.mrb[10].mxu0 %vm421_vm5, %v509_v54  ;;  %3682 = vmatprep.subr.bf16.mxu1 %v3681_v51  ;;  %v3685_v54 = vpack.c.bf16 %v933_v53, %v932_v52 }
 0x505   :  { %3684 = vmatpush3.bf16.msra.mxu1 %v3681_v51 }
 0x506   :  { %3686 = vmatprep.subr.bf16.mxu1 %v3685_v54 }
 0x509   :  { %3688 = vmatpush3.bf16.msra.mxu1 %v3685_v54 }
 0x50a   :  { %3690 = vmatprep.subr.bf16.mxu1 %v3689_v59 }
 0x50c   :  { %v4360_v55 = vpop.f32.mrb[2].mxu0 }
 0x50d   :  { %v4362_v56 = vpop.f32.mrb[3].mxu0  ;;  %3692 = vmatpush3.bf16.msra.mxu1 %v3689_v59  ;;  %v147_v43 = vadd.f32 %v4360_v55, %v4195_v15 }
 0x50e   :  { %3694 = vmatprep.subr.bf16.mxu1 %v3693_v62 }
 0x50f   :  { %v157_v49 = vadd.f32 %v153_v47, %v147_v43 }
 0x511   :  { %3696 = vmatpush3.bf16.msra.mxu1 %v3693_v62  ;;  %v4514_v31 = vmul.f32 0.16666667, %v157_v49  ;;  %v2907_v49 = vld [vmem:[%s5076_s2 + $0x78] sm:$0xff] }
 0x5c9   :  { %v3306_v63 = vpop.f32.mrb[4].mxu0 }
 0x5ca   :  { %v624_v0 = vpop.f32.mrb[5].mxu0 }
 0x5cd   :  { %v3309_v1 = vpop.f32.mrb[6].mxu0 }
 0x5ce   :  { %667 = vrot.lane.b32.xlu1 %v3309_v1, %s4129_s29  ;;  %v634_v2 = vpop.f32.mrb[7].mxu0 }
 0x5d1   :  { %v3312_v3 = vpop.f32.mrb[8].mxu0 }
 0x5d2   :  { %665 = vrot.lane.b32.xlu1 %v634_v2, %s4129_s29  ;;  %v644_v4 = vpop.f32.mrb[9].mxu0 }
 0x5d3   :  { %673 = vrot.lane.b32.xlu0 %v644_v4, %s4130_s30 }
 0x5d5   :  { %v3315_v5 = vpop.f32.mrb[10].mxu0 }
 0x5d6   :  { %675 = vrot.lane.b32.xlu1 %v3312_v3, %s4130_s30  ;;  %v654_v6 = vpop.f32.mrb[11].mxu0 }
 0x5d7   :  { %681 = vrot.lane.b32.xlu0 %v654_v6, %s4131_s5 }
 0x5da   :  { %683 = vrot.lane.b32.xlu1 %v3315_v5, %s4131_s5 }
 0x640   :  { %v668_v7 = vpop.permute.xlu1 %667 }
 0x641   :  { %v688_v16 = vsel %vm283_vm3, %v3306_v63, %v668_v7 }
 0x644   :  { %v666_v8 = vpop.permute.xlu1 %665 }
 0x645   :  { %v674_v9 = vpop.permute.xlu0 %673  ;;  %v687_v10 = vsel %vm283_vm3, %v624_v0, %v666_v8 }
 0x646   :  { %v690_v12 = vsel %vm689_vm6, %v687_v10, %v674_v9 }
 0x648   :  { %v676_v11 = vpop.permute.xlu1 %675 }
 0x649   :  { %v682_v13 = vpop.permute.xlu0 %681  ;;  %v691_v17 = vsel %vm689_vm6, %v688_v16, %v676_v11  ;;  %v2944_v16 = vld [vmem:[%s5073_s3 + $0x80] ss:$0 sm:$0xff] }
 0x64a   :  { %v693_v14 = vsel %vm692_vm7, %v690_v12, %v682_v13 }
 0x64b   :  { %3324 = vmatprep.mubr.msk.f32.mxu0 %vm171_vm2, %v693_v14 }
 0x64c   :  { %v684_v18 = vpop.permute.xlu1 %683 }
 0x64d   :  { %v694_v19 = vsel %vm692_vm7, %v691_v17, %v684_v18  ;;  %v2945_v18 = vld [vmem:[%s5073_s3 + $0x88] ss:$0 sm:$0xff] }
 0x64e   :  { %3325 = vmatmul.mubr.msk.f32.vlgmr.msra.gmra.mrb[12].mxu0 %vm171_vm2, %v694_v19 }
 0x64f   :  { %3664 = vmatpush3.bf16.msra.mxu0 %v3661_v34 }
 0x650   :  { %3666 = vmatprep.subr.bf16.mxu0 %v3665_v38 }
 0x653   :  { %3668 = vmatpush3.bf16.msra.mxu0 %v3665_v38 }
 0x721   :  { %v3326_v20 = vpop.f32.mrb[12].mxu0 }
 0x722   :  { %v782_v21 = vadd.f32 %v3326_v20, %v2941_v36  ;;  %v776_v22 = vpop.f32.mrb[13].mxu0 }
 0x723   :  { %v777_v23 = vadd.f32 %v2941_v36, %v776_v22 }
 0x724   :  { %v4394_v26 = vadd.f32 %v782_v21, %v4207_v25 }
 0x725   :  { %v4397_v27 = vadd.f32 %v777_v23, %v4205_v24 }
 0x726   :  { %v790_v28 = vsel %vm171_vm2, %v4394_v26, 0.0  ;;  %v797_v25 = vmul.f32 %v4394_v26, %v4394_v26 }
 0x727   :  { %791 = vadd.xlane.f32.xlu1 %v790_v28  ;;  %v787_v29 = vsel %vm171_vm2, %v4397_v27, 0.0  ;;  %v796_v40 = vmul.f32 %v4397_v27, %v4397_v27  ;;  %v938_v28 = vld [vmem:[%s5073_s3 + $0x128] sm:$0xff] }
 0x728   :  { %788 = vadd.xlane.f32.xlu0 %v787_v29  ;;  %v801_v24 = vsel %vm171_vm2, %v797_v25, 0.0 }
 0x729   :  { %v798_v30 = vsel %vm171_vm2, %v796_v40, 0.0  ;;  %v1110_v40 = vld [vmem:[%s5073_s3 + $0x160] sm:$0xff] }
 0x72c   :  { %799 = vadd.xlane.f32.xlu0 %v798_v30  ;;  %v1111_v30 = vld [vmem:[%s5073_s3 + $0x168] sm:$0xff] }
 0x72d   :  { %v3701_v25 = vpack.c.bf16 %v1111_v30, %v1110_v40  ;;  %v2902_v40 = vld [vmem:[%s5076_s2 + $0x50] sm:$0xff] }
 0x730   :  { %802 = vadd.xlane.f32.xlu0 %v801_v24  ;;  %v142_v24 = vadd.f32 %v4195_v15, %v4362_v56  ;;  %v1113_v56 = vld [vmem:[%s5073_s3 + $0x178] sm:$0xff] }
 0x731   :  { %v3705_v46 = vpack.c.bf16 %v1113_v56, %v1112_v41 }
 0x732   :  { %v156_v38 = vadd.f32 %v152_v37, %v142_v24  ;;  %v2903_v24 = vld [vmem:[%s5076_s2 + $0x58] sm:$0xff] }
 0x734   :  { %v4510_v48 = vmul.f32 0.16666667, %v156_v38 }
 0x7b4   :  { %v792_v1 = vpop.xlane.xlu1 %791 }
 0x7b5   :  { %v789_v63 = vpop.xlane.xlu0 %788  ;;  %v795_v3 = vmul.f32 0.03125, %v792_v1 }
 0x7b6   :  { %v794_v0 = vmul.f32 0.03125, %v789_v63 }
 0x7b7   :  { %v807_v8 = vmul.f32 %v795_v3, %v795_v3  ;;  %v811_v19 = vsub.f32 %v4394_v26, %v795_v3  ;;  %v939_v26 = vld [vmem:[%s5073_s3 + $0x130] sm:$0xff] }
 0x7b8   :  { %v806_v4 = vmul.f32 %v794_v0, %v794_v0  ;;  %v810_v13 = vsub.f32 %v4397_v27, %v794_v0  ;;  %v3697_v29 = vpack.c.bf16 %v939_v26, %v938_v28 }
 0x7b9   :  { %v800_v2 = vpop.xlane.xlu0 %799 }
 0x7ba   :  { %v804_v5 = vmul.f32 0.03125, %v800_v2  ;;  %3698 = vmatprep.subr.bf16.mxu1 %v3697_v29 }
 0x7bb   :  { %3700 = vmatpush3.bf16.msra.mxu1 %v3697_v29 }
 0x7bc   :  { %v808_v6 = vsub.f32 %v804_v5, %v806_v4  ;;  %3702 = vmatprep.subr.bf16.mxu1 %v3701_v25 }
 0x7bd   :  { %v803_v7 = vpop.xlane.xlu0 %802 }
 0x7be   :  { %v812_v9 = vadd.f32 1e-05, %v808_v6  ;;  %v805_v10 = vmul.f32 0.03125, %v803_v7 }
 0x7c0   :  { %4024 = vrsqrt.f32 %v812_v9  ;;  %v809_v11 = vsub.f32 %v805_v10, %v807_v8 }
 0x7c2   :  { %v813_v12 = vadd.f32 1e-05, %v809_v11 }
 0x7c4   :  { %4026 = vrsqrt.f32 %v813_v12 }
 0x7ca   :  { %v4025_v14 = vpop.eup %4024 }
 0x7cb   :  { %v816_v17 = vmul.f32 %v4025_v14, %v810_v13 }
 0x7cd   :  { %v823_v36 = vmul.f32 %v2944_v16, %v816_v17 }
 0x7ce   :  { %v4027_v20 = vpop.eup %4026 }
 0x7cf   :  { %v817_v21 = vmul.f32 %v4027_v20, %v811_v19  ;;  %v4471_v22 = vadd.f32 %v2945_v18, %v823_v36  ;;  %v2901_v36 = vld [vmem:[%s5076_s2 + $0x48] sm:$0xff]  ;;  %v2900_v20 = vld [vmem:[%s5076_s2 + $0x40] sm:$0xff] }
 0x7d1   :  { %v824_v23 = vmul.f32 %v2944_v16, %v817_v21  ;;  %3335 = vmatprep.mubr.msk.f32.mxu0 %vm171_vm2, %v4471_v22 }
 0x7d3   :  { %v4475_v27 = vadd.f32 %v2945_v18, %v824_v23 }
 0x7d5   :  { %3336 = vmatmul.mubr.msk.f32.vlgmr.msra.gmra.mrb[14].mxu0 %vm171_vm2, %v4475_v27 }
 0x8a8   :  { %v3337_v33 = vpop.f32.mrb[14].mxu0 }
 0x8a9   :  { %v919_v34 = vadd.f32 %v3337_v33, %v2946_v32  ;;  %v913_v35 = vpop.f32.mrb[15].mxu0  ;;  %v2904_v33 = vld [vmem:[%s5076_s2 + $0x60] sm:$0xff] }
 0x8aa   :  { %v914_v39 = vadd.f32 %v2946_v32, %v913_v35 }
 0x8ab   :  { %v923_v45 = vmax.f32 %v919_v34, 0.0 }
 0x8ac   :  { %v922_v42 = vmax.f32 %v914_v39, 0.0  ;;  %v2905_v39 = vld [vmem:[%s5076_s2 + $0x68] sm:$0xff] }
 0x8ae   :  { %3370 = vmatprep.mubr.f32.mxu1 %v922_v42  ;;  %v2906_v42 = vld [vmem:[%s5076_s2 + $0x70] sm:$0xff] }
 0x8af   :  { %3371 = vmatmul.mubr.f32.vlgmr.msra.gmra.mrb[10].mxu1 %v923_v45 }
 0x8b0   :  { %3704 = vmatpush3.bf16.msra.mxu1 %v3701_v25  ;;  %3381 = vmatprep.mubr.msk.f32.mxu1 %vm171_vm2, %v4510_v48 }
 0x8b1   :  { %3706 = vmatprep.subr.bf16.mxu1 %v3705_v46 }
 0x8b4   :  { %3708 = vmatpush3.bf16.msra.mxu1 %v3705_v46 }
 0x8b7   :  { %3382 = vmatmul.mubr.msk.f32.vlgmr.msra.gmra.mrb[12].mxu1 %vm171_vm2, %v4514_v31 }
 0x982   :  { %v4518_v15 = vpop.f32.mrb[10].mxu1 }
 0x983   :  { %v4520_v55 = vpop.f32.mrb[11].mxu1 }
 0x98a   :  { %v3383_v51 = vpop.f32.mrb[12].mxu1 }
 0x98b   :  { %v1197_v52 = vadd.f32 %v3383_v51, %v2954_v50  ;;  %v1191_v53 = vpop.f32.mrb[13].mxu1 }
 0x98c   :  { %v1192_v54 = vadd.f32 %v2954_v50, %v1191_v53 }
 0x98d   :  { %1204 = vrot.lane.b32.xlu0 %v1197_v52, %s4125_s20 }
 0x98e   :  { %1202 = vrot.lane.b32.xlu1 %v1192_v54, %s4125_s20  ;;  %3400 = vmatprep.mubr.msk.f32.mxu0 %vm283_vm3, %v1192_v54  ;;  %v4530_v57 = vpack.i.bf16 %v1197_v52, %v1192_v54 }
 0x991   :  { %1210 = vrot.lane.b32.xlu0 %v1192_v54, %s4126_s21 }
 0x992   :  { %1206 = vrot.lane.b32.xlu1 %v1192_v54, %s4124_s19 }
 0x995   :  { %3918 = vrot.lane.b32.xlu0 %v4530_v57, %s4127_s22 }
 0x996   :  { %1208 = vrot.lane.b32.xlu1 %v1197_v52, %s4124_s19 }
 0x99a   :  { %1212 = vrot.lane.b32.xlu1 %v1197_v52, %s4126_s21 }
 0x9ff   :  { %v1205_v58 = vpop.permute.xlu0 %1204 }
 0xa00   :  { %v1203_v59 = vpop.permute.xlu1 %1202 }
 0xa01   :  { %v4536_v60 = vpack.i.bf16 %v1205_v58, %v1203_v59 }
 0xa03   :  { %v1211_v61 = vpop.permute.xlu0 %1210  ;;  %3923 = vrot.lane.b32.xlu1 %v4536_v60, %s4127_s22 }
 0xa04   :  { %v1207_v62 = vpop.permute.xlu1 %1206 }
 0xa07   :  { %v3919_v63 = vpop.permute.xlu0 %3918 }
 0xa08   :  { %v3921_v0 = vunpack.i.h.bf16 %v3919_v63  ;;  %v3920_v1 = vunpack.i.l.bf16 %v3919_v63  ;;  %v1209_v2 = vpop.permute.xlu1 %1208 }
 0xa09   :  { %v4540_v3 = vpack.i.bf16 %v1209_v2, %v1207_v62 }
 0xa0a   :  { %v3709_v4 = vpack.c.bf16 %v3921_v0, %v3920_v1 }
 0xa0b   :  { %3928 = vrot.lane.b32.xlu0 %v4540_v3, %s4127_s22 }
 0xa0c   :  { %3711 = vmatprep.subr.msk.bf16.mxu0 %vm4241_vm4, %v3709_v4  ;;  %v1213_v5 = vpop.permute.xlu1 %1212 }
 0xa0d   :  { %v4546_v6 = vpack.i.bf16 %v1213_v5, %v1211_v61  ;;  %3714 = vmatpush3.bf16.xpose.msk.msra.mxu0 %vm4241_vm4, %v3709_v4 }
 0xa0f   :  { %3933 = vrot.lane.b32.xlu1 %v4546_v6, %s4127_s22 }
 0xa75   :  { %v3924_v7 = vpop.permute.xlu1 %3923 }
 0xa76   :  { %v3926_v8 = vunpack.i.h.bf16 %v3924_v7  ;;  %v3925_v9 = vunpack.i.l.bf16 %v3924_v7 }
 0xa78   :  { %v3715_v10 = vpack.c.bf16 %v3926_v8, %v3925_v9 }
 0xa7a   :  { %3717 = vmatprep.subr.msk.bf16.mxu0 %vm4241_vm4, %v3715_v10 }
 0xa7b   :  { %3720 = vmatpush3.bf16.xpose.msk.msra.mxu0 %vm4241_vm4, %v3715_v10 }
 0xa7d   :  { %v3929_v11 = vpop.permute.xlu0 %3928 }
 0xa7e   :  { %v3931_v12 = vunpack.i.h.bf16 %v3929_v11  ;;  %v3930_v13 = vunpack.i.l.bf16 %v3929_v11 }
 0xa80   :  { %v3721_v14 = vpack.c.bf16 %v3931_v12, %v3930_v13 }
 0xa81   :  { %v3934_v16 = vpop.permute.xlu1 %3933 }
 0xa82   :  { %v3936_v17 = vunpack.i.h.bf16 %v3934_v16  ;;  %v3935_v18 = vunpack.i.l.bf16 %v3934_v16  ;;  %3723 = vmatprep.subr.msk.bf16.mxu0 %vm4241_vm4, %v3721_v14 }
 0xa83   :  { %3726 = vmatpush3.bf16.xpose.msk.msra.mxu0 %vm4241_vm4, %v3721_v14 }
 0xa84   :  { %v3727_v19 = vpack.c.bf16 %v3936_v17, %v3935_v18 }
 0xa86   :  { %3729 = vmatprep.subr.msk.bf16.mxu0 %vm4241_vm4, %v3727_v19 }
 0xa8b   :  { %3732 = vmatpush3.bf16.xpose.msk.msra.mxu0 %vm4241_vm4, %v3727_v19 }
 0xa92   :  { %3401 = vmatmul.mubr.msk.f32.vlgmr.msra.gmra.mrb[16].mxu0 %vm283_vm3, %v1197_v52 }
 0xa93   :  { %3403 = vmatprep.mubr.msk.f32.mxu0 %vm283_vm3, %v1203_v59 }
 0xa96   :  { %3404 = vmatmul.mubr.msk.f32.gmra.mrb[18].mxu0 %vm283_vm3, %v1205_v58 }
 0xa97   :  { %3406 = vmatprep.mubr.msk.f32.mxu0 %vm283_vm3, %v1207_v62 }
 0xa9a   :  { %3407 = vmatmul.mubr.msk.f32.gmra.mrb[20].mxu0 %vm283_vm3, %v1209_v2 }
 0xa9b   :  { %3409 = vmatprep.mubr.msk.f32.mxu0 %vm283_vm3, %v1211_v61 }
 0xa9e   :  { %3410 = vmatmul.mubr.msk.f32.gmra.mrb[22].mxu0 %vm283_vm3, %v1213_v5 }
 0xb65   :  { %v3402_v21 = vpop.f32.mrb[16].mxu0 }
 0xb66   :  { %v1334_v23 = vadd.f32 %v3402_v21, %v2901_v36  ;;  %v1328_v28 = vpop.f32.mrb[17].mxu0 }
 0xb67   :  { %v1329_v26 = vadd.f32 %v2900_v20, %v1328_v28 }
 0xb68   :  { %v1370_v29 = vsel %vm421_vm5, %v1334_v23, -inf }
 0xb69   :  { %1371 = vmax.xlane.f32.xlu1 %v1370_v29  ;;  %v3405_v30 = vpop.f32.mrb[18].mxu0  ;;  %v1367_v25 = vsel %vm421_vm5, %v1329_v26, -inf }
 0xb6a   :  { %v1338_v32 = vpop.f32.mrb[19].mxu0  ;;  %1368 = vmax.xlane.f32.xlu0 %v1367_v25  ;;  %v1344_v34 = vadd.f32 %v3405_v30, %v2903_v24 }
 0xb6b   :  { %v1339_v37 = vadd.f32 %v2902_v40, %v1338_v32 }
 0xb6c   :  { %v1376_v47 = vsel %vm421_vm5, %v1344_v34, -inf }
 0xb6d   :  { %v3408_v35 = vpop.f32.mrb[20].mxu0  ;;  %v1373_v38 = vsel %vm421_vm5, %v1339_v37, -inf }
 0xb6e   :  { %v1348_v41 = vpop.f32.mrb[21].mxu0  ;;  %1374 = vmax.xlane.f32.xlu0 %v1373_v38  ;;  %v1354_v43 = vadd.f32 %v3408_v35, %v2905_v39 }
 0xb6f   :  { %v1349_v56 = vadd.f32 %v2904_v33, %v1348_v41 }
 0xb70   :  { %v1382_v54 = vsel %vm421_vm5, %v1354_v43, -inf }
 0xb71   :  { %v3411_v45 = vpop.f32.mrb[22].mxu0  ;;  %v1379_v46 = vsel %vm421_vm5, %v1349_v56, -inf }
 0xb72   :  { %v1358_v50 = vpop.f32.mrb[23].mxu0  ;;  %1380 = vmax.xlane.f32.xlu1 %v1379_v46  ;;  %1377 = vmax.xlane.f32.xlu0 %v1376_v47  ;;  %v1364_v52 = vadd.f32 %v3411_v45, %v2907_v49 }
 0xb73   :  { %v1359_v51 = vadd.f32 %v2906_v42, %v1358_v50 }
 0xb74   :  { %v1388_v58 = vsel %vm421_vm5, %v1364_v52, -inf }
 0xb75   :  { %v1385_v53 = vsel %vm421_vm5, %v1359_v51, -inf }
 0xb76   :  { %1386 = vmax.xlane.f32.xlu1 %v1385_v53  ;;  %1383 = vmax.xlane.f32.xlu0 %v1382_v54 }
 0xb7a   :  { %1389 = vmax.xlane.f32.xlu0 %v1388_v58 }
 0xb87   :  { %3938 = vrot.lane.b32.xlu1 %v4530_v57, %s4128_s13 }
 0xbf6   :  { %v1372_v59 = vpop.xlane.xlu1 %1371 }
 0xbf7   :  { %v1392_v61 = vsub.f32 %v1334_v23, %v1372_v59  ;;  %v1369_v62 = vpop.xlane.xlu0 %1368 }
 0xbf8   :  { %v1391_v63 = vsub.f32 %v1329_v26, %v1369_v62 }
 0xbf9   :  { %v1401_v0 = vmul.f32 1.442695, %v1392_v61 }
 0xbfa   :  { %v1399_v1 = vmul.f32 1.442695, %v1391_v63 }
 0xbfb   :  { %4028 = vpow2.f32 %v1401_v0  ;;  %v1375_v2 = vpop.xlane.xlu0 %1374 }
 0xbfc   :  { %4030 = vpow2.f32 %v1399_v1  ;;  %v1393_v4 = vsub.f32 %v1339_v37, %v1375_v2 }
 0xbfe   :  { %v1403_v5 = vmul.f32 1.442695, %v1393_v4 }
 0xbff   :  { %v1381_v7 = vpop.xlane.xlu1 %1380  ;;  %v1378_v8 = vpop.xlane.xlu0 %1377 }
 0xc00   :  { %4032 = vpow2.f32 %v1403_v5  ;;  %v1395_v9 = vsub.f32 %v1349_v56, %v1381_v7  ;;  %v1394_v10 = vsub.f32 %v1344_v34, %v1378_v8 }
 0xc02   :  { %v1407_v11 = vmul.f32 1.442695, %v1395_v9  ;;  %v1405_v12 = vmul.f32 1.442695, %v1394_v10 }
 0xc03   :  { %v1387_v13 = vpop.xlane.xlu1 %1386  ;;  %v1384_v57 = vpop.xlane.xlu0 %1383 }
 0xc04   :  { %4034 = vpow2.f32 %v1407_v11  ;;  %v1396_v14 = vsub.f32 %v1354_v43, %v1384_v57  ;;  %v1397_v36 = vsub.f32 %v1359_v51, %v1387_v13 }
 0xc05   :  { %v4605_v16 = vpop.eup %4028  ;;  %4036 = vpow2.f32 %v1405_v12 }
 0xc06   :  { %v4031_v17 = vpop.eup %4030  ;;  %v1409_v18 = vmul.f32 1.442695, %v1396_v14  ;;  %v1418_v19 = vsel %vm421_vm5, %v4605_v16, 0.0  ;;  %v1411_v24 = vmul.f32 1.442695, %v1397_v36 }
 0xc07   :  { %v3939_v20 = vpop.permute.xlu1 %3938  ;;  %1419 = vadd.xlane.f32.xlu0 %v1418_v19  ;;  %v1390_v21 = vpop.xlane.xlu0 %1389  ;;  %v1415_v23 = vsel %vm421_vm5, %v4031_v17, 0.0 }
 0xc08   :  { %v3941_v28 = vunpack.i.h.bf16 %v3939_v20  ;;  %v3940_v26 = vunpack.i.l.bf16 %v3939_v20  ;;  %v1398_v29 = vsub.f32 %v1364_v52, %v1390_v21  ;;  %1416 = vadd.xlane.f32.xlu1 %v1415_v23  ;;  %4038 = vpow2.f32 %v1409_v18  ;;  %v1638_v20 = vld [vmem:[%s5073_s3 + $0x188] sm:$0xff]  ;;  %v1639_v21 = vld [vmem:[%s5073_s3 + $0x190] sm:$0xff] }
 0xc09   :  { %v3749_v23 = vpack.c.bf16 %v1639_v21, %v1638_v20 }
 0xc0a   :  { %v4610_v40 = vpop.eup %4032  ;;  %v3733_v30 = vpack.c.bf16 %v3941_v28, %v3940_v26  ;;  %v1413_v25 = vmul.f32 1.442695, %v1398_v29  ;;  %v1640_v28 = vld [vmem:[%s5073_s3 + $0x198] sm:$0xff]  ;;  %v1641_v26 = vld [vmem:[%s5073_s3 + $0x1a0] sm:$0xff] }
 0xc0b   :  { %v1421_v32 = vsel %vm421_vm5, %v4610_v40, 0.0  ;;  %v3753_v29 = vpack.c.bf16 %v1641_v26, %v1640_v28 }
 0xc0c   :  { %4040 = vpow2.f32 %v1413_v25  ;;  %3734 = vmatprep.subr.bf16.mxu1 %v3733_v30  ;;  %1422 = vadd.xlane.f32.xlu1 %v1421_v32 }
 0xc0d   :  { %3736 = vmatpush3.bf16.msra.mxu1 %v3733_v30  ;;  %4042 = vpow2.f32 %v1411_v24 }
 0xc0e   :  { %v4614_v37 = vpop.eup %4034 }
 0xc0f   :  { %v4616_v33 = vpop.eup %4036  ;;  %v1427_v34 = vsel %vm421_vm5, %v4614_v37, 0.0 }
 0xc10   :  { %1428 = vadd.xlane.f32.xlu1 %v1427_v34  ;;  %v1424_v35 = vsel %vm421_vm5, %v4616_v33, 0.0 }
 0xc11   :  { %1425 = vadd.xlane.f32.xlu0 %v1424_v35  ;;  %v2949_v35 = vld [vmem:[%s5073_s3 + $0x138] ss:$0 sm:$0xff] }
 0xc12   :  { %v4622_v38 = vpop.eup %4038 }
 0xc13   :  { %v1430_v39 = vsel %vm421_vm5, %v4622_v38, 0.0 }
 0xc15   :  { %1431 = vadd.xlane.f32.xlu0 %v1430_v39  ;;  %v1017_v39 = vadd.f32 %v4518_v15, %v2949_v35 }
 0xc16   :  { %v4626_v41 = vpop.eup %4040 }
 0xc17   :  { %v1436_v56 = vsel %vm421_vm5, %v4626_v41, 0.0  ;;  %v4043_v42 = vpop.eup %4042 }
 0xc18   :  { %v1433_v43 = vsel %vm421_vm5, %v4043_v42, 0.0 }
 0xc19   :  { %1437 = vadd.xlane.f32.xlu0 %v1436_v56  ;;  %v1021_v56 = vadd.f32 %v1017_v39, %v4475_v27 }
 0xc1d   :  { %1434 = vadd.xlane.f32.xlu0 %v1433_v43 }
 0xc21   :  { %3948 = vrot.lane.b32.xlu1 %v4540_v3, %s4128_s13 }
 0xc25   :  { %3953 = vrot.lane.b32.xlu1 %v4546_v6, %s4128_s13 }
 0xc33   :  { %3943 = vrot.lane.b32.xlu0 %v4536_v60, %s4128_s13 }
 0xc94   :  { %v1420_v46 = vpop.xlane.xlu0 %1419 }
 0xc95   :  { %v1417_v45 = vpop.xlane.xlu1 %1416 }
 0xc96   :  { %4044 = vrcp.f32 %v1417_v45 }
 0xc97   :  { %4046 = vrcp.f32 %v1420_v46  ;;  %v1031_v46 = vmul.f32 %v1021_v56, %v1021_v56 }
 0xc99   :  { %v1423_v47 = vpop.xlane.xlu1 %1422 }
 0xc9a   :  { %4048 = vrcp.f32 %v1423_v47  ;;  %v1025_v47 = vsel %vm171_vm2, %v1021_v56, 0.0 }
 0xc9d   :  { %v1429_v53 = vpop.xlane.xlu1 %1428 }
 0xc9e   :  { %v1426_v49 = vpop.xlane.xlu0 %1425 }
 0xc9f   :  { %4050 = vrcp.f32 %v1426_v49  ;;  %v1035_v49 = vsel %vm171_vm2, %v1031_v46, 0.0 }
 0xca0   :  { %v4045_v50 = vpop.eup %4044  ;;  %4052 = vrcp.f32 %v1429_v53 }
 0xca1   :  { %v1447_v51 = vmul.f32 %v4045_v50, %v4031_v17  ;;  %v3949_v58 = vpop.permute.xlu1 %3948  ;;  %v4047_v7 = vpop.eup %4046 }
 0xca2   :  { %v1432_v52 = vpop.xlane.xlu0 %1431  ;;  %v3951_v61 = vunpack.i.h.bf16 %v3949_v58  ;;  %v3950_v6 = vunpack.i.l.bf16 %v3949_v58  ;;  %v1448_v9 = vmul.f32 %v4047_v7, %v4605_v16 }
 0xca3   :  { %3428 = vmatprep.mubr.msk.f32.mxu1 %vm421_vm5, %v1447_v51  ;;  %4054 = vrcp.f32 %v1432_v52 }
 0xca4   :  { %v3741_v1 = vpack.c.bf16 %v3951_v61, %v3950_v6  ;;  %v4049_v8 = vpop.eup %4048 }
 0xca5   :  { %v3954_v60 = vpop.permute.xlu1 %3953  ;;  %v1449_v11 = vmul.f32 %v4049_v8, %v4610_v40 }
 0xca6   :  { %v1438_v54 = vpop.xlane.xlu0 %1437  ;;  %v3956_v2 = vunpack.i.h.bf16 %v3954_v60  ;;  %v3955_v4 = vunpack.i.l.bf16 %v3954_v60 }
 0xca8   :  { %v3745_v5 = vpack.c.bf16 %v3956_v2, %v3955_v4 }
 0xca9   :  { %v4051_v10 = vpop.eup %4050 }
 0xcaa   :  { %v1435_v3 = vpop.xlane.xlu0 %1434  ;;  %v4053_v12 = vpop.eup %4052  ;;  %v1450_v13 = vmul.f32 %v4051_v10, %v4616_v33 }
 0xcab   :  { %4056 = vrcp.f32 %v1435_v3  ;;  %v1451_v14 = vmul.f32 %v4053_v12, %v4614_v37 }
 0xcac   :  { %4058 = vrcp.f32 %v1438_v54 }
 0xcad   :  { %v4055_v57 = vpop.eup %4054 }
 0xcae   :  { %v3944_v59 = vpop.permute.xlu0 %3943  ;;  %v1452_v16 = vmul.f32 %v4055_v57, %v4622_v38  ;;  %v1012_v38 = vadd.f32 %v2949_v35, %v4520_v55  ;;  %v2981_v35 = vld [vmem:[%s5073_s3 + $0x1a8] ss:$0 sm:$0xff] }
 0xcaf   :  { %v3946_v62 = vunpack.i.h.bf16 %v3944_v59  ;;  %v3945_v63 = vunpack.i.l.bf16 %v3944_v59 }
 0xcb1   :  { %v3737_v0 = vpack.c.bf16 %v3946_v62, %v3945_v63 }
 0xcb3   :  { %3738 = vmatprep.subr.bf16.mxu1 %v3737_v0 }
 0xcb4   :  { %3740 = vmatpush3.bf16.msra.mxu1 %v3737_v0 }
 0xcb5   :  { %3742 = vmatprep.subr.bf16.mxu1 %v3741_v1  ;;  %v4057_v17 = vpop.eup %4056 }
 0xcb6   :  { %v4059_v18 = vpop.eup %4058  ;;  %v1453_v19 = vmul.f32 %v4057_v17, %v4043_v42 }
 0xcb7   :  { %v1454_v36 = vmul.f32 %v4059_v18, %v4626_v41  ;;  %v1020_v41 = vadd.f32 %v1012_v38, %v4471_v22 }
 0xcb8   :  { %3744 = vmatpush3.bf16.msra.mxu1 %v3741_v1 }
 0xcb9   :  { %3746 = vmatprep.subr.bf16.mxu1 %v3745_v5  ;;  %v1022_v42 = vsel %vm171_vm2, %v1020_v41, 0.0  ;;  %v1030_v43 = vmul.f32 %v1020_v41, %v1020_v41 }
 0xcbb   :  { %v1032_v45 = vsel %vm171_vm2, %v1030_v43, 0.0 }
 0xcbc   :  { %3748 = vmatpush3.bf16.msra.mxu1 %v3745_v5 }
 0xcbd   :  { %3750 = vmatprep.subr.bf16.mxu1 %v3749_v23 }
 0xcbf   :  { %3429 = vmatmul.mubr.msk.f32.vlgmr.msra.gmra.mrb[14].mxu1 %vm421_vm5, %v1448_v9 }
 0xcc0   :  { %3431 = vmatprep.mubr.msk.f32.mxu1 %vm421_vm5, %v1449_v11  ;;  %3752 = vmatpush3.bf16.msra.mxu1 %v3749_v23 }
 0xcc1   :  { %3754 = vmatprep.subr.bf16.mxu1 %v3753_v29 }
 0xcc3   :  { %3432 = vmatmul.mubr.msk.f32.gmra.mrb[16].mxu1 %vm421_vm5, %v1450_v13  ;;  %v2950_v13 = vld [vmem:[%s5073_s3 + $0x140] ss:$0 sm:$0xff] }
 0xcc4   :  { %3434 = vmatprep.mubr.msk.f32.mxu1 %vm421_vm5, %v1451_v14  ;;  %3756 = vmatpush3.bf16.msra.mxu1 %v3753_v29  ;;  %v2951_v14 = vld [vmem:[%s5073_s3 + $0x148] ss:$0 sm:$0xff] }
 0xcc7   :  { %3435 = vmatmul.mubr.msk.f32.gmra.mrb[18].mxu1 %vm421_vm5, %v1452_v16 }
 0xcc8   :  { %3437 = vmatprep.mubr.msk.f32.mxu1 %vm421_vm5, %v1453_v19 }
 0xccb   :  { %3438 = vmatmul.mubr.msk.f32.gmra.mrb[20].mxu1 %vm421_vm5, %v1454_v36 }
 0xd92   :  { %v3430_v40 = vpop.f32.mrb[14].mxu1 }
 0xd93   :  { %v1569_v30 = vpop.f32.mrb[15].mxu1 }
 0xd96   :  { %v3433_v25 = vpop.f32.mrb[16].mxu1 }
 0xd97   :  { %1612 = vrot.lane.b32.xlu1 %v3433_v25, %s4129_s29  ;;  %v1579_v24 = vpop.f32.mrb[17].mxu1  ;;  %v1864_v25 = vld [vmem:[%s5073_s3 + $0x1e8] sm:$0xff] }
 0xd9a   :  { %v3436_v32 = vpop.f32.mrb[18].mxu1 }
 0xd9b   :  { %1610 = vrot.lane.b32.xlu1 %v1579_v24, %s4129_s29  ;;  %v1589_v37 = vpop.f32.mrb[19].mxu1  ;;  %v1865_v24 = vld [vmem:[%s5073_s3 + $0x1f0] sm:$0xff] }
 0xd9c   :  { %1618 = vrot.lane.b32.xlu0 %v1589_v37, %s4130_s30  ;;  %v1866_v37 = vld [vmem:[%s5073_s3 + $0x1f8] sm:$0xff] }
 0xd9e   :  { %v3439_v33 = vpop.f32.mrb[20].mxu1 }
 0xd9f   :  { %1620 = vrot.lane.b32.xlu1 %v3436_v32, %s4130_s30  ;;  %v1599_v34 = vpop.f32.mrb[21].mxu1  ;;  %v3765_v32 = vpack.c.bf16 %v1865_v24, %v1864_v25 }
 0xda0   :  { %1626 = vrot.lane.b32.xlu0 %v1599_v34, %s4131_s5 }
 0xda1   :  { %3766 = vmatprep.subr.bf16.mxu1 %v3765_v32 }
 0xda3   :  { %1628 = vrot.lane.b32.xlu1 %v3439_v33, %s4131_s5  ;;  %v1867_v33 = vld [vmem:[%s5073_s3 + $0x200] sm:$0xff] }
 0xda4   :  { %v3769_v34 = vpack.c.bf16 %v1867_v33, %v1866_v37 }
 0xdbf   :  { %1023 = vadd.xlane.f32.xlu0 %v1022_v42 }
 0xdc3   :  { %1033 = vadd.xlane.f32.xlu0 %v1032_v45 }
 0xdc7   :  { %1026 = vadd.xlane.f32.xlu1 %v1025_v47  ;;  %1036 = vadd.xlane.f32.xlu0 %v1035_v49 }
 0xe09   :  { %v1613_v55 = vpop.permute.xlu1 %1612 }
 0xe0a   :  { %v1633_v54 = vsel %vm283_vm3, %v3430_v40, %v1613_v55 }
 0xe0d   :  { %v1611_v15 = vpop.permute.xlu1 %1610 }
 0xe0e   :  { %v1619_v50 = vpop.permute.xlu0 %1618  ;;  %v1632_v22 = vsel %vm283_vm3, %v1569_v30, %v1611_v15 }
 0xe0f   :  { %v1634_v51 = vsel %vm689_vm6, %v1632_v22, %v1619_v50 }
 0xe11   :  { %v1621_v27 = vpop.permute.xlu1 %1620 }
 0xe12   :  { %v1627_v52 = vpop.permute.xlu0 %1626  ;;  %v1635_v58 = vsel %vm689_vm6, %v1633_v54, %v1621_v27 }
 0xe13   :  { %v1636_v53 = vsel %vm692_vm7, %v1634_v51, %v1627_v52 }
 0xe14   :  { %3448 = vmatprep.mubr.msk.f32.mxu1 %vm171_vm2, %v1636_v53 }
 0xe15   :  { %v1629_v3 = vpop.permute.xlu1 %1628 }
 0xe16   :  { %v1637_v59 = vsel %vm692_vm7, %v1635_v58, %v1629_v3 }
 0xe17   :  { %3449 = vmatmul.mubr.msk.f32.vlgmr.msra.gmra.mrb[22].mxu1 %vm171_vm2, %v1637_v59 }
 0xe18   :  { %3768 = vmatpush3.bf16.msra.mxu1 %v3765_v32 }
 0xe19   :  { %3770 = vmatprep.subr.bf16.mxu1 %v3769_v34 }
 0xe1c   :  { %3772 = vmatpush3.bf16.msra.mxu1 %v3769_v34  ;;  %v2984_v34 = vld [vmem:[%s5073_s3 + $0x1b0] ss:$0 sm:$0xff] }
 0xe4c   :  { %v1024_v61 = vpop.xlane.xlu0 %1023 }
 0xe4d   :  { %v1028_v6 = vmul.f32 0.03125, %v1024_v61 }
 0xe4f   :  { %v1040_v63 = vmul.f32 %v1028_v6, %v1028_v6  ;;  %v1044_v11 = vsub.f32 %v1020_v41, %v1028_v6 }
 0xe50   :  { %v1034_v62 = vpop.xlane.xlu0 %1033 }
 0xe51   :  { %v1038_v60 = vmul.f32 0.03125, %v1034_v62  ;;  %v1774_v62 = vld [vmem:[%s5073_s3 + $0x1c0] sm:$0xff] }
 0xe53   :  { %v1042_v0 = vsub.f32 %v1038_v60, %v1040_v63  ;;  %v1775_v63 = vld [vmem:[%s5073_s3 + $0x1c8] sm:$0xff]  ;;  %v1776_v60 = vld [vmem:[%s5073_s3 + $0x1d0] sm:$0xff] }
 0xe54   :  { %v1027_v1 = vpop.xlane.xlu1 %1026  ;;  %v1037_v2 = vpop.xlane.xlu0 %1036 }
 0xe55   :  { %v1046_v4 = vadd.f32 1e-05, %v1042_v0  ;;  %v1029_v5 = vmul.f32 0.03125, %v1027_v1  ;;  %v1039_v8 = vmul.f32 0.03125, %v1037_v2  ;;  %v3757_v1 = vpack.c.bf16 %v1775_v63, %v1774_v62  ;;  %v1777_v2 = vld [vmem:[%s5073_s3 + $0x1d8] sm:$0xff] }
 0xe57   :  { %4060 = vrsqrt.f32 %v1046_v4  ;;  %v1041_v7 = vmul.f32 %v1029_v5, %v1029_v5  ;;  %v1045_v16 = vsub.f32 %v1021_v56, %v1029_v5  ;;  %v2952_v5 = vld [vmem:[%s5073_s3 + $0x150] ss:$0 sm:$0xff]  ;;  %3758 = vmatprep.subr.bf16.mxu0 %v3757_v1 }
 0xe58   :  { %3760 = vmatpush3.bf16.msra.mxu0 %v3757_v1 }
 0xe59   :  { %v1043_v9 = vsub.f32 %v1039_v8, %v1041_v7  ;;  %v3761_v7 = vpack.c.bf16 %v1777_v2, %v1776_v60 }
 0xe5b   :  { %v1047_v10 = vadd.f32 1e-05, %v1043_v9  ;;  %v2953_v9 = vld [vmem:[%s5073_s3 + $0x158] ss:$0 sm:$0xff]  ;;  %3762 = vmatprep.subr.bf16.mxu0 %v3761_v7 }
 0xe5c   :  { %3764 = vmatpush3.bf16.msra.mxu0 %v3761_v7 }
 0xe5d   :  { %4062 = vrsqrt.f32 %v1047_v10 }
 0xe61   :  { %v4061_v12 = vpop.eup %4060 }
 0xe62   :  { %v1050_v57 = vmul.f32 %v4061_v12, %v1044_v11 }
 0xe64   :  { %v1057_v17 = vmul.f32 %v2950_v13, %v1050_v57 }
 0xe66   :  { %v4694_v18 = vadd.f32 %v2951_v14, %v1057_v17 }
 0xe67   :  { %v4063_v19 = vpop.eup %4062 }
 0xe68   :  { %v1066_v36 = vsel %vm171_vm2, %v4694_v18, 0.0  ;;  %v1074_v20 = vmul.f32 %v4694_v18, %v4694_v18  ;;  %v1051_v21 = vmul.f32 %v4063_v19, %v1045_v16 }
 0xe69   :  { %1067 = vadd.xlane.f32.xlu1 %v1066_v36 }
 0xe6a   :  { %v1058_v23 = vmul.f32 %v2950_v13, %v1051_v21  ;;  %v1076_v28 = vsel %vm171_vm2, %v1074_v20, 0.0 }
 0xe6c   :  { %v4701_v26 = vadd.f32 %v2951_v14, %v1058_v23 }
 0xe6d   :  { %1077 = vadd.xlane.f32.xlu1 %v1076_v28 }
 0xe6e   :  { %v1069_v29 = vsel %vm171_vm2, %v4701_v26, 0.0  ;;  %v1075_v40 = vmul.f32 %v4701_v26, %v4701_v26 }
 0xe6f   :  { %1070 = vadd.xlane.f32.xlu0 %v1069_v29 }
 0xe70   :  { %v1079_v30 = vsel %vm171_vm2, %v1075_v40, 0.0 }
 0xe73   :  { %1080 = vadd.xlane.f32.xlu0 %v1079_v30 }
 0xeea   :  { %v3450_v38 = vpop.f32.mrb[22].mxu1 }
 0xeeb   :  { %v1725_v39 = vadd.f32 %v3450_v38, %v2981_v35  ;;  %v1719_v41 = vpop.f32.mrb[23].mxu1 }
 0xeec   :  { %v1720_v56 = vadd.f32 %v2981_v35, %v1719_v41 }
 0xeed   :  { %v4724_v42 = vadd.f32 %v1725_v39, %v4514_v31 }
 0xeee   :  { %v4727_v43 = vadd.f32 %v1720_v56, %v4510_v48  ;;  %v2985_v56 = vld [vmem:[%s5073_s3 + $0x1b8] ss:$0 sm:$0xff] }
 0xeef   :  { %v1733_v45 = vsel %vm171_vm2, %v4724_v42, 0.0  ;;  %v1739_v46 = vmul.f32 %v4724_v42, %v4724_v42 }
 0xef0   :  { %1734 = vadd.xlane.f32.xlu0 %v1733_v45  ;;  %v1730_v47 = vsel %vm171_vm2, %v4727_v43, 0.0  ;;  %v1738_v49 = vmul.f32 %v4727_v43, %v4727_v43 }
 0xef1   :  { %1731 = vadd.xlane.f32.xlu1 %v1730_v47  ;;  %v1743_v31 = vsel %vm171_vm2, %v1739_v46, 0.0 }
 0xef2   :  { %v1740_v48 = vsel %vm171_vm2, %v1738_v49, 0.0 }
 0xef4   :  { %1744 = vadd.xlane.f32.xlu0 %v1743_v31 }
 0xef5   :  { %1741 = vadd.xlane.f32.xlu1 %v1740_v48 }
 0xef6   :  { %v1068_v55 = vpop.xlane.xlu1 %1067 }
 0xef7   :  { %v1072_v15 = vmul.f32 0.03125, %v1068_v55 }
 0xef9   :  { %v1084_v22 = vmul.f32 %v1072_v15, %v1072_v15  ;;  %v1088_v0 = vsub.f32 %v4694_v18, %v1072_v15 }
 0xefa   :  { %v1078_v50 = vpop.xlane.xlu1 %1077 }
 0xefb   :  { %v1082_v27 = vmul.f32 0.03125, %v1078_v50 }
 0xefc   :  { %v1071_v51 = vpop.xlane.xlu0 %1070 }
 0xefd   :  { %v1086_v52 = vsub.f32 %v1082_v27, %v1084_v22  ;;  %v1073_v53 = vmul.f32 0.03125, %v1071_v51 }
 0xeff   :  { %v1090_v54 = vadd.f32 1e-05, %v1086_v52  ;;  %v1085_v3 = vmul.f32 %v1073_v53, %v1073_v53  ;;  %v1089_v11 = vsub.f32 %v4701_v26, %v1073_v53 }
 0xf00   :  { %v1081_v58 = vpop.xlane.xlu0 %1080 }
 0xf01   :  { %4064 = vrsqrt.f32 %v1090_v54  ;;  %v1083_v59 = vmul.f32 0.03125, %v1081_v58 }
 0xf03   :  { %v1087_v61 = vsub.f32 %v1083_v59, %v1085_v3 }
 0xf05   :  { %v1091_v6 = vadd.f32 1e-05, %v1087_v61 }
 0xf07   :  { %4066 = vrsqrt.f32 %v1091_v6  ;;  %v2986_v6 = vld [vmem:[%s5073_s3 + $0x1e0] ss:$0 sm:$0xff] }
 0xf0b   :  { %v4065_v4 = vpop.eup %4064 }
 0xf0c   :  { %v1094_v8 = vmul.f32 %v4065_v4, %v1088_v0 }
 0xf0e   :  { %v1101_v10 = vmul.f32 %v2952_v5, %v1094_v8 }
 0xf10   :  { %v1108_v12 = vadd.f32 %v2953_v9, %v1101_v10  ;;  %v4116_v10 = vld [vmem:[%s5076_s2 + $0x8] sm:$0xff] }
 0xf11   :  { %v4067_v13 = vpop.eup %4066 }
 0xf12   :  { %v1095_v57 = vmul.f32 %v4067_v13, %v1089_v11  ;;  %3470 = vmatprep.mubr.msk.f32.mxu1 %vm171_vm2, %v1108_v12  ;;  %v4117_v13 = vld [vmem:[%s5076_s2] sm:$0xff] }
 0xf14   :  { %v1102_v14 = vmul.f32 %v2952_v5, %v1095_v57 }
 0xf16   :  { %v1109_v17 = vadd.f32 %v2953_v9, %v1102_v14 }
 0xf18   :  { %3471 = vmatmul.mubr.msk.f32.vlgmr.msra.gmra.mrb[24].mxu1 %vm171_vm2, %v1109_v17 }
 0xf7d   :  { %v1735_v16 = vpop.xlane.xlu0 %1734 }
 0xf7e   :  { %v1737_v18 = vmul.f32 0.03125, %v1735_v16  ;;  %v1732_v19 = vpop.xlane.xlu1 %1731 }
 0xf7f   :  { %v1736_v36 = vmul.f32 0.03125, %v1732_v19 }
 0xf80   :  { %v1749_v21 = vmul.f32 %v1737_v18, %v1737_v18  ;;  %v1753_v32 = vsub.f32 %v4724_v42, %v1737_v18  ;;  %v2989_v42 = vld [vmem:[%s5073_s3 + $0x208] ss:$0 sm:$0xff]  ;;  %v4118_v18 = vld [vmem:[%s5076_s2 + $0x18] sm:$0xff] }
 0xf81   :  { %v1745_v20 = vpop.xlane.xlu0 %1744  ;;  %v1748_v29 = vmul.f32 %v1736_v36, %v1736_v36  ;;  %v1752_v33 = vsub.f32 %v4727_v43, %v1736_v36 }
 0xf82   :  { %v1747_v23 = vmul.f32 0.03125, %v1745_v20  ;;  %v1742_v28 = vpop.xlane.xlu1 %1741  ;;  %v4119_v20 = vld [vmem:[%s5076_s2 + $0x10] sm:$0xff] }
 0xf83   :  { %v1746_v26 = vmul.f32 0.03125, %v1742_v28 }
 0xf84   :  { %v1751_v40 = vsub.f32 %v1747_v23, %v1749_v21 }
 0xf85   :  { %v1750_v30 = vsub.f32 %v1746_v26, %v1748_v29  ;;  %v4120_v26 = vld [vmem:[%s5076_s2 + $0x28] sm:$0xff] }
 0xf86   :  { %v1755_v25 = vadd.f32 1e-05, %v1751_v40 }
 0xf87   :  { %v1754_v24 = vadd.f32 1e-05, %v1750_v30 }
 0xf88   :  { %4068 = vrsqrt.f32 %v1755_v25  ;;  %v4121_v25 = vld [vmem:[%s5076_s2 + $0x20] sm:$0xff] }
 0xf89   :  { %4070 = vrsqrt.f32 %v1754_v24 }
 0xf92   :  { %v4069_v37 = vpop.eup %4068 }
 0xf93   :  { %v4071_v35 = vpop.eup %4070  ;;  %v1759_v38 = vmul.f32 %v4069_v37, %v1753_v32 }
 0xf94   :  { %v1758_v39 = vmul.f32 %v4071_v35, %v1752_v33 }
 0xf95   :  { %v1766_v41 = vmul.f32 %v2984_v34, %v1759_v38 }
 0xf96   :  { %v1765_v45 = vmul.f32 %v2984_v34, %v1758_v39  ;;  %v4122_v34 = vld [vmem:[%s5076_s2 + $0x38] sm:$0xff]  ;;  %v4123_v39 = vld [vmem:[%s5076_s2 + $0x30] sm:$0xff] }
 0xf97   :  { %v4771_v47 = vadd.f32 %v2985_v56, %v1766_v41 }
 0xf98   :  { %v4769_v46 = vadd.f32 %v2985_v56, %v1765_v45 }
 0xf9a   :  { %3459 = vmatprep.mubr.msk.f32.mxu0 %vm171_vm2, %v4769_v46 }
 0xf9b   :  { %3460 = vmatmul.mubr.msk.f32.vlgmr.msra.gmra.mrb[24].mxu0 %vm171_vm2, %v4771_v47 }
 0xfeb   :  { %v3472_v43 = vpop.f32.mrb[24].mxu1 }
 0xfec   :  { %v1951_v49 = vadd.f32 %v3472_v43, %v2989_v42  ;;  %v1945_v31 = vpop.f32.mrb[25].mxu1 }
 0xfed   :  { %v1946_v48 = vadd.f32 %v2989_v42, %v1945_v31 }
 0xfef   :  { %v4780_v55 = vpack.i.bf16 %v1951_v49, %v1946_v48  ;;  %v3773_v15 = vpack.c.bf16 %v1951_v49, %v1946_v48 }
 0xff1   :  { %3963 = vrot.lane.b32.xlu0 %v4780_v55, %s4124_s19  ;;  %3958 = vrot.lane.b32.xlu1 %v4780_v55, %s4125_s20 }
 0xff2   :  { %3775 = vmatprep.subr.msk.bf16.mxu0 %vm4241_vm4, %v3773_v15 }
 0xff3   :  { %3778 = vmatpush3.bf16.xpose.msk.msra.mxu0 %vm4241_vm4, %v3773_v15 }
 0xff5   :  { %3968 = vrot.lane.b32.xlu1 %v4780_v55, %s4126_s21 }
0x1063   :  { %v4792_v50 = vpop.permute.xlu1 %3958  ;;  %v4794_v22 = vpop.permute.xlu0 %3963 }
0x1064   :  { %v3961_v27 = vunpack.i.h.bf16 %v4792_v50  ;;  %v3960_v51 = vunpack.i.l.bf16 %v4792_v50  ;;  %v3966_v52 = vunpack.i.h.bf16 %v4794_v22  ;;  %v3965_v53 = vunpack.i.l.bf16 %v4794_v22 }
0x1066   :  { %v3779_v54 = vpack.c.bf16 %v3961_v27, %v3960_v51  ;;  %v3785_v3 = vpack.c.bf16 %v3966_v52, %v3965_v53 }
0x1067   :  { %v4800_v58 = vpop.permute.xlu1 %3968 }
0x1068   :  { %v3971_v59 = vunpack.i.h.bf16 %v4800_v58  ;;  %v3970_v61 = vunpack.i.l.bf16 %v4800_v58  ;;  %3781 = vmatprep.subr.msk.bf16.mxu0 %vm4241_vm4, %v3779_v54 }
0x1069   :  { %3784 = vmatpush3.bf16.xpose.msk.msra.mxu0 %vm4241_vm4, %v3779_v54 }
0x106a   :  { %3787 = vmatprep.subr.msk.bf16.mxu0 %vm4241_vm4, %v3785_v3  ;;  %v3791_v0 = vpack.c.bf16 %v3971_v59, %v3970_v61 }
0x106e   :  { %v3461_v62 = vpop.f32.mrb[24].mxu0 }
0x106f   :  { %v1861_v63 = vadd.f32 %v3461_v62, %v2986_v6  ;;  %v1855_v60 = vpop.f32.mrb[25].mxu0 }
0x1070   :  { %v1856_v1 = vadd.f32 %v2986_v6, %v1855_v60 }
0x1071   :  { %1958 = vrot.lane.b32.xlu0 %v1861_v63, %s4125_s20  ;;  %3790 = vmatpush3.bf16.xpose.msk.msra.mxu0 %vm4241_vm4, %v3785_v3 }
0x1072   :  { %1956 = vrot.lane.b32.xlu1 %v1856_v1, %s4125_s20  ;;  %3793 = vmatprep.subr.msk.bf16.mxu0 %vm4241_vm4, %v3791_v0 }
0x1073   :  { %3489 = vmatprep.mubr.msk.f32.mxu0 %vm283_vm3, %v1856_v1 }
0x1075   :  { %1962 = vrot.lane.b32.xlu0 %v1861_v63, %s4124_s19 }
0x1076   :  { %1960 = vrot.lane.b32.xlu1 %v1856_v1, %s4124_s19 }
0x1079   :  { %1966 = vrot.lane.b32.xlu0 %v1861_v63, %s4126_s21  ;;  %3796 = vmatpush3.bf16.xpose.msk.msra.mxu0 %vm4241_vm4, %v3791_v0 }
0x107a   :  { %1964 = vrot.lane.b32.xlu1 %v1856_v1, %s4126_s21 }
0x1080   :  { %3490 = vmatmul.mubr.msk.f32.vlgmr.msra.gmra.mrb[26].mxu0 %vm283_vm3, %v1861_v63 }
0x10e3   :  { %v1959_v2 = vpop.permute.xlu0 %1958 }
0x10e4   :  { %v1957_v4 = vpop.permute.xlu1 %1956 }
0x10e5   :  { %3492 = vmatprep.mubr.msk.f32.mxu0 %vm283_vm3, %v1957_v4 }
0x10e6   :  { %3493 = vmatmul.mubr.msk.f32.gmra.mrb[28].mxu0 %vm283_vm3, %v1959_v2 }
0x10e7   :  { %v1963_v5 = vpop.permute.xlu0 %1962 }
0x10e8   :  { %v1961_v7 = vpop.permute.xlu1 %1960 }
0x10e9   :  { %3495 = vmatprep.mubr.msk.f32.mxu0 %vm283_vm3, %v1961_v7 }
0x10ea   :  { %3496 = vmatmul.mubr.msk.f32.gmra.mrb[30].mxu0 %vm283_vm3, %v1963_v5 }
0x10eb   :  { %v1967_v9 = vpop.permute.xlu0 %1966 }
0x10ec   :  { %v1965_v8 = vpop.permute.xlu1 %1964 }
0x10ed   :  { %3498 = vmatprep.mubr.msk.f32.mxu0 %vm283_vm3, %v1965_v8 }
0x10ee   :  { %3499 = vmatmul.mubr.msk.f32.gmra.mrb[32].mxu0 %vm283_vm3, %v1967_v9 }
0x1153   :  { %v3491_v44 = vpop.f32.mrb[26].mxu0 }
0x1154   :  { %v2086_v11 = vadd.f32 %v4116_v10, %v3491_v44  ;;  %v2080_v12 = vpop.f32.mrb[27].mxu0 }
0x1155   :  { %v2081_v57 = vadd.f32 %v4117_v13, %v2080_v12 }
0x1156   :  { %v2122_v14 = vsel %vm421_vm5, %v2086_v11, -inf }
0x1157   :  { %2123 = vmax.xlane.f32.xlu0 %v2122_v14  ;;  %v2119_v17 = vsel %vm421_vm5, %v2081_v57, -inf }
0x1158   :  { %2120 = vmax.xlane.f32.xlu1 %v2119_v17 }
0x11b9   :  { %v3494_v16 = vpop.f32.mrb[28].mxu0 }
0x11ba   :  { %v2096_v19 = vadd.f32 %v4118_v18, %v3494_v16  ;;  %v2090_v36 = vpop.f32.mrb[29].mxu0 }
0x11bb   :  { %v2091_v21 = vadd.f32 %v4119_v20, %v2090_v36 }
0x11bc   :  { %v2128_v23 = vsel %vm421_vm5, %v2096_v19, -inf }
0x11bd   :  { %v3497_v28 = vpop.f32.mrb[30].mxu0  ;;  %2129 = vmax.xlane.f32.xlu1 %v2128_v23  ;;  %v2125_v29 = vsel %vm421_vm5, %v2091_v21, -inf }
0x11be   :  { %v2106_v40 = vadd.f32 %v4120_v26, %v3497_v28  ;;  %v2100_v30 = vpop.f32.mrb[31].mxu0  ;;  %2126 = vmax.xlane.f32.xlu0 %v2125_v29 }
0x11bf   :  { %v2101_v24 = vadd.f32 %v4121_v25, %v2100_v30 }
0x11c0   :  { %v2134_v32 = vsel %vm421_vm5, %v2106_v40, -inf }
0x11c1   :  { %v3500_v37 = vpop.f32.mrb[32].mxu0  ;;  %2135 = vmax.xlane.f32.xlu1 %v2134_v32  ;;  %v2131_v33 = vsel %vm421_vm5, %v2101_v24, -inf }
0x11c2   :  { %v2116_v35 = vadd.f32 %v4122_v34, %v3500_v37  ;;  %v2110_v38 = vpop.f32.mrb[33].mxu0  ;;  %2132 = vmax.xlane.f32.xlu0 %v2131_v33 }
0x11c3   :  { %v2111_v41 = vadd.f32 %v4123_v39, %v2110_v38 }
0x11c4   :  { %v2140_v56 = vsel %vm421_vm5, %v2116_v35, -inf }
0x11c5   :  { %2141 = vmax.xlane.f32.xlu1 %v2140_v56  ;;  %v2137_v45 = vsel %vm421_vm5, %v2111_v41, -inf }
0x11c6   :  { %2138 = vmax.xlane.f32.xlu0 %v2137_v45 }
0x11dc   :  { %3973 = vrot.lane.b32.xlu0 %v4780_v55, %s4127_s22 }
0x11e4   :  { %v2124_v42 = vpop.xlane.xlu0 %2123 }
0x11e5   :  { %v2144_v43 = vsub.f32 %v2086_v11, %v2124_v42  ;;  %v2121_v49 = vpop.xlane.xlu1 %2120 }
0x11e6   :  { %v2143_v31 = vsub.f32 %v2081_v57, %v2121_v49 }
0x11e7   :  { %v2153_v48 = vmul.f32 1.442695, %v2144_v43 }
0x11e8   :  { %v2151_v15 = vmul.f32 1.442695, %v2143_v31 }
0x11e9   :  { %4072 = vpow2.f32 %v2153_v48 }
0x11ea   :  { %4074 = vpow2.f32 %v2151_v15 }
0x11f3   :  { %v4867_v27 = vpop.eup %4072 }
0x11f4   :  { %v2170_v51 = vsel %vm421_vm5, %v4867_v27, 0.0  ;;  %v4075_v52 = vpop.eup %4074 }
0x11f5   :  { %2171 = vadd.xlane.f32.xlu1 %v2170_v51  ;;  %v2167_v53 = vsel %vm421_vm5, %v4075_v52, 0.0 }
0x11fb   :  { %2168 = vadd.xlane.f32.xlu0 %v2167_v53 }
0x124a   :  { %v2130_v54 = vpop.xlane.xlu1 %2129 }
0x124b   :  { %v2146_v55 = vsub.f32 %v2096_v19, %v2130_v54  ;;  %v2127_v3 = vpop.xlane.xlu0 %2126 }
0x124c   :  { %v2145_v59 = vsub.f32 %v2091_v21, %v2127_v3 }
0x124d   :  { %v2157_v61 = vmul.f32 1.442695, %v2146_v55 }
0x124e   :  { %v2155_v6 = vmul.f32 1.442695, %v2145_v59  ;;  %v2136_v62 = vpop.xlane.xlu1 %2135 }
0x124f   :  { %4076 = vpow2.f32 %v2157_v61  ;;  %v2148_v63 = vsub.f32 %v2106_v40, %v2136_v62  ;;  %v2133_v60 = vpop.xlane.xlu0 %2132 }
0x1250   :  { %4078 = vpow2.f32 %v2155_v6  ;;  %v2147_v0 = vsub.f32 %v2101_v24, %v2133_v60  ;;  %v2390_v60 = vld [vmem:[%s5073_s3 + $0x210] sm:$0xff] }
0x1251   :  { %v2161_v1 = vmul.f32 1.442695, %v2148_v63 }
0x1252   :  { %v2159_v2 = vmul.f32 1.442695, %v2147_v0  ;;  %v2142_v4 = vpop.xlane.xlu1 %2141  ;;  %v2391_v0 = vld [vmem:[%s5073_s3 + $0x218] sm:$0xff] }
0x1253   :  { %4080 = vpow2.f32 %v2161_v1  ;;  %v2150_v5 = vsub.f32 %v2116_v35, %v2142_v4  ;;  %v2139_v7 = vpop.xlane.xlu0 %2138  ;;  %v3813_v1 = vpack.c.bf16 %v2391_v0, %v2390_v60  ;;  %v2393_v4 = vld [vmem:[%s5073_s3 + $0x228] sm:$0xff]  ;;  %v2631_v60 = vld [vmem:[%s5073_s3 + $0x2d8] sm:$0xff] }
0x1254   :  { %4082 = vpow2.f32 %v2159_v2  ;;  %v2149_v8 = vsub.f32 %v2111_v41, %v2139_v7  ;;  %v2392_v2 = vld [vmem:[%s5073_s3 + $0x220] sm:$0xff] }
0x1255   :  { %v2165_v9 = vmul.f32 1.442695, %v2150_v5  ;;  %v3817_v5 = vpack.c.bf16 %v2393_v4, %v2392_v2 }
0x1256   :  { %v2163_v44 = vmul.f32 1.442695, %v2149_v8 }
0x1257   :  { %4084 = vpow2.f32 %v2165_v9  ;;  %v3974_v10 = vpop.permute.xlu0 %3973 }
0x1258   :  { %v3976_v11 = vunpack.i.h.bf16 %v3974_v10  ;;  %v3975_v12 = vunpack.i.l.bf16 %v3974_v10  ;;  %4086 = vpow2.f32 %v2163_v44 }
0x1259   :  { %v4872_v13 = vpop.eup %4076 }
0x125a   :  { %v4874_v57 = vpop.eup %4078  ;;  %v3797_v14 = vpack.c.bf16 %v3976_v11, %v3975_v12  ;;  %v2176_v17 = vsel %vm421_vm5, %v4872_v13, 0.0 }
0x125b   :  { %2177 = vadd.xlane.f32.xlu1 %v2176_v17  ;;  %v2173_v16 = vsel %vm421_vm5, %v4874_v57, 0.0 }
0x125c   :  { %3798 = vmatprep.subr.bf16.mxu1 %v3797_v14  ;;  %2174 = vadd.xlane.f32.xlu0 %v2173_v16 }
0x125d   :  { %v4880_v18 = vpop.eup %4080  ;;  %3800 = vmatpush3.bf16.msra.mxu1 %v3797_v14 }
0x125e   :  { %v4083_v19 = vpop.eup %4082  ;;  %v2182_v36 = vsel %vm421_vm5, %v4880_v18, 0.0 }
0x125f   :  { %2183 = vadd.xlane.f32.xlu1 %v2182_v36  ;;  %v2179_v20 = vsel %vm421_vm5, %v4083_v19, 0.0 }
0x1260   :  { %2180 = vadd.xlane.f32.xlu0 %v2179_v20 }
0x1261   :  { %v4885_v21 = vpop.eup %4084 }
0x1262   :  { %v2188_v23 = vsel %vm421_vm5, %v4885_v21, 0.0  ;;  %v4087_v28 = vpop.eup %4086 }
0x1263   :  { %2189 = vadd.xlane.f32.xlu1 %v2188_v23  ;;  %v2185_v29 = vsel %vm421_vm5, %v4087_v28, 0.0 }
0x1267   :  { %2186 = vadd.xlane.f32.xlu1 %v2185_v29 }
0x1276   :  { %3983 = vrot.lane.b32.xlu0 %v4794_v22, %s4127_s22 }
0x1278   :  { %3978 = vrot.lane.b32.xlu1 %v4792_v50, %s4127_s22 }
0x127a   :  { %3988 = vrot.lane.b32.xlu0 %v4800_v58, %s4127_s22 }
0x1282   :  { %v2172_v25 = vpop.xlane.xlu1 %2171 }
0x1288   :  { %v2169_v26 = vpop.xlane.xlu0 %2168 }
0x1289   :  { %4088 = vrcp.f32 %v2169_v26  ;;  %v3016_v26 = vld [vmem:[%s5073_s3 + $0x230] ss:$0 sm:$0xff] }
0x128a   :  { %4090 = vrcp.f32 %v2172_v25 }
0x1293   :  { %v4089_v40 = vpop.eup %4088 }
0x1294   :  { %v2199_v30 = vmul.f32 %v4089_v40, %v4075_v52  ;;  %v4091_v48 = vpop.eup %4090 }
0x1295   :  { %v2200_v51 = vmul.f32 %v4091_v48, %v4867_v27 }
0x1296   :  { %3517 = vmatprep.mubr.msk.f32.mxu1 %vm421_vm5, %v2199_v30 }
0x12e8   :  { %v2178_v24 = vpop.xlane.xlu1 %2177 }
0x12e9   :  { %v2175_v32 = vpop.xlane.xlu0 %2174 }
0x12ea   :  { %4092 = vrcp.f32 %v2175_v32 }
0x12eb   :  { %4094 = vrcp.f32 %v2178_v24 }
0x12ec   :  { %v2184_v37 = vpop.xlane.xlu1 %2183 }
0x12ed   :  { %v2181_v33 = vpop.xlane.xlu0 %2180 }
0x12ee   :  { %4096 = vrcp.f32 %v2181_v33 }
0x12ef   :  { %4098 = vrcp.f32 %v2184_v37 }
0x12f0   :  { %v2190_v34 = vpop.xlane.xlu1 %2189 }
0x12f1   :  { %v3984_v35 = vpop.permute.xlu0 %3983 }
0x12f2   :  { %v3986_v39 = vunpack.i.h.bf16 %v3984_v35  ;;  %v3985_v50 = vunpack.i.l.bf16 %v3984_v35 }
0x12f4   :  { %v2187_v22 = vpop.xlane.xlu1 %2186  ;;  %v3805_v42 = vpack.c.bf16 %v3986_v39, %v3985_v50  ;;  %v4093_v15 = vpop.eup %4092  ;;  %v2527_v39 = vld [vmem:[%s5073_s3 + $0x250] sm:$0xff]  ;;  %v2528_v50 = vld [vmem:[%s5073_s3 + $0x258] sm:$0xff] }
0x12f5   :  { %v3989_v58 = vpop.permute.xlu0 %3988  ;;  %4100 = vrcp.f32 %v2187_v22  ;;  %v4095_v52 = vpop.eup %4094  ;;  %v2201_v53 = vmul.f32 %v4093_v15, %v4874_v57  ;;  %v2622_v15 = vld [vmem:[%s5073_s3 + $0x290] sm:$0xff] }
0x12f6   :  { %v3991_v43 = vunpack.i.h.bf16 %v3989_v58  ;;  %v3990_v49 = vunpack.i.l.bf16 %v3989_v58  ;;  %4102 = vrcp.f32 %v2190_v34  ;;  %v2202_v55 = vmul.f32 %v4095_v52, %v4872_v13 }
0x12f8   :  { %v3979_v38 = vpop.permute.xlu1 %3978  ;;  %v3809_v31 = vpack.c.bf16 %v3991_v43, %v3990_v49  ;;  %v4097_v54 = vpop.eup %4096  ;;  %v2620_v43 = vld [vmem:[%s5073_s3 + $0x280] sm:$0xff] }
0x12f9   :  { %v3981_v41 = vunpack.i.h.bf16 %v3979_v38  ;;  %v3980_v56 = vunpack.i.l.bf16 %v3979_v38  ;;  %v4099_v3 = vpop.eup %4098  ;;  %v2203_v59 = vmul.f32 %v4097_v54, %v4083_v19  ;;  %v2526_v38 = vld [vmem:[%s5073_s3 + $0x248] sm:$0xff] }
0x12fa   :  { %v2204_v6 = vmul.f32 %v4099_v3, %v4880_v18  ;;  %v2625_v54 = vld [vmem:[%s5073_s3 + $0x2a8] sm:$0xff]  ;;  %v2626_v3 = vld [vmem:[%s5073_s3 + $0x2b0] sm:$0xff] }
0x12fb   :  { %v3801_v45 = vpack.c.bf16 %v3981_v41, %v3980_v56  ;;  %v3821_v41 = vpack.c.bf16 %v2527_v39, %v2526_v38  ;;  %v2529_v56 = vld [vmem:[%s5073_s3 + $0x260] sm:$0xff] }
0x12fc   :  { %v3825_v58 = vpack.c.bf16 %v2529_v56, %v2528_v50 }
0x12fd   :  { %3802 = vmatprep.subr.bf16.mxu1 %v3801_v45 }
0x12fe   :  { %3804 = vmatpush3.bf16.msra.mxu1 %v3801_v45  ;;  %v2618_v45 = vld [vmem:[%s5073_s3 + $0x270] sm:$0xff] }
0x12ff   :  { %3806 = vmatprep.subr.bf16.mxu1 %v3805_v42  ;;  %v4101_v61 = vpop.eup %4100 }
0x1300   :  { %v4103_v27 = vpop.eup %4102  ;;  %v2205_v62 = vmul.f32 %v4101_v61, %v4087_v28 }
0x1301   :  { %v2206_v63 = vmul.f32 %v4103_v27, %v4885_v21  ;;  %v2629_v27 = vld [vmem:[%s5073_s3 + $0x2c8] sm:$0xff] }
0x1302   :  { %3808 = vmatpush3.bf16.msra.mxu1 %v3805_v42  ;;  %v2619_v42 = vld [vmem:[%s5073_s3 + $0x278] sm:$0xff] }
0x1303   :  { %3810 = vmatprep.subr.bf16.mxu1 %v3809_v31  ;;  %v3829_v49 = vpack.c.bf16 %v2619_v42, %v2618_v45 }
0x1305   :  { %3830 = vmatprep.subr.bf16.mxu0 %v3829_v49 }
0x1306   :  { %3812 = vmatpush3.bf16.msra.mxu1 %v3809_v31  ;;  %v2621_v31 = vld [vmem:[%s5073_s3 + $0x288] sm:$0xff]  ;;  %3832 = vmatpush3.bf16.msra.mxu0 %v3829_v49 }
0x1307   :  { %3814 = vmatprep.subr.bf16.mxu1 %v3813_v1  ;;  %v3833_v48 = vpack.c.bf16 %v2621_v31, %v2620_v43 }
0x1309   :  { %3518 = vmatmul.mubr.msk.f32.vlgmr.msra.gmra.mrb[26].mxu1 %vm421_vm5, %v2200_v51  ;;  %v2623_v51 = vld [vmem:[%s5073_s3 + $0x298] sm:$0xff]  ;;  %3834 = vmatprep.subr.bf16.mxu0 %v3833_v48 }
0x130a   :  { %3520 = vmatprep.mubr.msk.f32.mxu1 %vm421_vm5, %v2201_v53  ;;  %3816 = vmatpush3.bf16.msra.mxu1 %v3813_v1  ;;  %v3837_v52 = vpack.c.bf16 %v2623_v51, %v2622_v15  ;;  %v2624_v53 = vld [vmem:[%s5073_s3 + $0x2a0] sm:$0xff] }
0x130b   :  { %3818 = vmatprep.subr.bf16.mxu1 %v3817_v5  ;;  %3836 = vmatpush3.bf16.msra.mxu0 %v3833_v48 }
0x130c   :  { %3838 = vmatprep.subr.bf16.mxu0 %v3837_v52 }
0x130d   :  { %3521 = vmatmul.mubr.msk.f32.gmra.mrb[28].mxu1 %vm421_vm5, %v2202_v55  ;;  %v3841_v55 = vpack.c.bf16 %v2625_v54, %v2624_v53 }
0x130e   :  { %3523 = vmatprep.mubr.msk.f32.mxu1 %vm421_vm5, %v2203_v59  ;;  %3820 = vmatpush3.bf16.msra.mxu1 %v3817_v5  ;;  %v2627_v59 = vld [vmem:[%s5073_s3 + $0x2b8] sm:$0xff] }
0x130f   :  { %3822 = vmatprep.subr.bf16.mxu1 %v3821_v41  ;;  %3840 = vmatpush3.bf16.msra.mxu0 %v3837_v52  ;;  %v3845_v61 = vpack.c.bf16 %v2627_v59, %v2626_v3 }
0x1310   :  { %3842 = vmatprep.subr.bf16.mxu0 %v3841_v55 }
0x1311   :  { %3524 = vmatmul.mubr.msk.f32.gmra.mrb[30].mxu1 %vm421_vm5, %v2204_v6  ;;  %v2628_v6 = vld [vmem:[%s5073_s3 + $0x2c0] sm:$0xff] }
0x1312   :  { %3526 = vmatprep.mubr.msk.f32.mxu1 %vm421_vm5, %v2205_v62  ;;  %v3849_v62 = vpack.c.bf16 %v2629_v27, %v2628_v6 }
0x1313   :  { %3844 = vmatpush3.bf16.msra.mxu0 %v3841_v55 }
0x1314   :  { %3846 = vmatprep.subr.bf16.mxu0 %v3845_v61 }
0x1315   :  { %3527 = vmatmul.mubr.msk.f32.gmra.mrb[32].mxu1 %vm421_vm5, %v2206_v63  ;;  %v2630_v63 = vld [vmem:[%s5073_s3 + $0x2d0] sm:$0xff] }
0x1316   :  { %v3853_v0 = vpack.c.bf16 %v2631_v60, %v2630_v63 }
0x1317   :  { %3848 = vmatpush3.bf16.msra.mxu0 %v3845_v61 }
0x1318   :  { %3850 = vmatprep.subr.bf16.mxu0 %v3849_v62 }
0x131b   :  { %3852 = vmatpush3.bf16.msra.mxu0 %v3849_v62 }
0x131c   :  { %3854 = vmatprep.subr.bf16.mxu0 %v3853_v0 }
0x131f   :  { %3856 = vmatpush3.bf16.msra.mxu0 %v3853_v0 }
0x13dc   :  { %v3519_v7 = vpop.f32.mrb[26].mxu1 }
0x13dd   :  { %v2321_v8 = vpop.f32.mrb[27].mxu1 }
0x13e0   :  { %v3522_v9 = vpop.f32.mrb[28].mxu1 }
0x13e1   :  { %2364 = vrot.lane.b32.xlu0 %v3522_v9, %s4129_s29  ;;  %v2331_v44 = vpop.f32.mrb[29].mxu1 }
0x13e2   :  { %2362 = vrot.lane.b32.xlu1 %v2331_v44, %s4129_s29 }
0x13e4   :  { %v3525_v10 = vpop.f32.mrb[30].mxu1 }
0x13e5   :  { %2372 = vrot.lane.b32.xlu0 %v3525_v10, %s4130_s30  ;;  %v2341_v11 = vpop.f32.mrb[31].mxu1 }
0x13e6   :  { %2370 = vrot.lane.b32.xlu1 %v2341_v11, %s4130_s30 }
0x13e8   :  { %v3528_v12 = vpop.f32.mrb[32].mxu1 }
0x13e9   :  { %2380 = vrot.lane.b32.xlu0 %v3528_v12, %s4131_s5  ;;  %v2351_v13 = vpop.f32.mrb[33].mxu1 }
0x13ea   :  { %2378 = vrot.lane.b32.xlu1 %v2351_v13, %s4131_s5 }
0x1453   :  { %v2365_v57 = vpop.permute.xlu0 %2364 }
0x1454   :  { %v2363_v14 = vpop.permute.xlu1 %2362  ;;  %v2385_v36 = vsel %vm283_vm3, %v3519_v7, %v2365_v57 }
0x1455   :  { %v2384_v18 = vsel %vm283_vm3, %v2321_v8, %v2363_v14 }
0x1457   :  { %v2373_v17 = vpop.permute.xlu0 %2372 }
0x1458   :  { %v2371_v16 = vpop.permute.xlu1 %2370  ;;  %v2387_v23 = vsel %vm689_vm6, %v2385_v36, %v2373_v17 }
0x1459   :  { %v2386_v20 = vsel %vm689_vm6, %v2384_v18, %v2371_v16 }
0x145b   :  { %v2381_v19 = vpop.permute.xlu0 %2380 }
0x145c   :  { %v2379_v21 = vpop.permute.xlu1 %2378  ;;  %v2389_v29 = vsel %vm692_vm7, %v2387_v23, %v2381_v19  ;;  %v3019_v19 = vld [vmem:[%s5073_s3 + $0x238] ss:$0 sm:$0xff]  ;;  %v3020_v23 = vld [vmem:[%s5073_s3 + $0x240] ss:$0 sm:$0xff] }
0x145d   :  { %v2388_v28 = vsel %vm692_vm7, %v2386_v20, %v2379_v21 }
0x145e   :  { %3537 = vmatprep.mubr.msk.f32.mxu1 %vm171_vm2, %v2388_v28 }
0x145f   :  { %3538 = vmatmul.mubr.msk.f32.vlgmr.msra.gmra.mrb[34].mxu1 %vm171_vm2, %v2389_v29 }
0x1460   :  { %3824 = vmatpush3.bf16.msra.mxu1 %v3821_v41 }
0x1461   :  { %3826 = vmatprep.subr.bf16.mxu1 %v3825_v58 }
0x1464   :  { %3828 = vmatpush3.bf16.msra.mxu1 %v3825_v58 }
0x1532   :  { %v3539_v40 = vpop.f32.mrb[34].mxu1 }
0x1533   :  { %v2477_v30 = vadd.f32 %v3539_v40, %v3016_v26  ;;  %v2471_v25 = vpop.f32.mrb[35].mxu1 }
0x1534   :  { %v2472_v24 = vadd.f32 %v3016_v26, %v2471_v25  ;;  %v2633_v25 = vld [vmem:[%s5073_s3 + $0x2e8] sm:$0xff] }
0x1535   :  { %v4939_v32 = vadd.f32 %v2477_v30, %v4771_v47  ;;  %v2632_v30 = vld [vmem:[%s5073_s3 + $0x2e0] sm:$0xff] }
0x1536   :  { %v4942_v37 = vadd.f32 %v2472_v24, %v4769_v46  ;;  %v3857_v24 = vpack.c.bf16 %v2633_v25, %v2632_v30 }
0x1537   :  { %v2485_v33 = vsel %vm171_vm2, %v4939_v32, 0.0  ;;  %v2491_v22 = vmul.f32 %v4939_v32, %v4939_v32 }
0x1538   :  { %2486 = vadd.xlane.f32.xlu0 %v2485_v33  ;;  %v2482_v34 = vsel %vm171_vm2, %v4942_v37, 0.0  ;;  %v2490_v35 = vmul.f32 %v4942_v37, %v4942_v37  ;;  %3858 = vmatprep.subr.bf16.mxu0 %v3857_v24 }
0x1539   :  { %2483 = vadd.xlane.f32.xlu1 %v2482_v34  ;;  %v2495_v46 = vsel %vm171_vm2, %v2491_v22, 0.0  ;;  %3860 = vmatpush3.bf16.msra.mxu0 %v3857_v24 }
0x153a   :  { %v2492_v47 = vsel %vm171_vm2, %v2490_v35, 0.0 }
0x153c   :  { %2493 = vadd.xlane.f32.xlu0 %v2492_v47 }
0x153d   :  { %2496 = vadd.xlane.f32.xlu1 %v2495_v46  ;;  %v3024_v46 = vld [vmem:[%s5073_s3 + $0x2f0] ss:$0 sm:$0xff] }
0x15c5   :  { %v2487_v1 = vpop.xlane.xlu0 %2486 }
0x15c6   :  { %v2484_v2 = vpop.xlane.xlu1 %2483  ;;  %v2489_v4 = vmul.f32 0.03125, %v2487_v1 }
0x15c7   :  { %v2488_v5 = vmul.f32 0.03125, %v2484_v2 }
0x15c8   :  { %v2501_v10 = vmul.f32 %v2489_v4, %v2489_v4  ;;  %v2505_v18 = vsub.f32 %v4939_v32, %v2489_v4  ;;  %v3021_v32 = vld [vmem:[%s5073_s3 + $0x268] ss:$0 sm:$0xff]  ;;  %v3025_v4 = vld [vmem:[%s5073_s3 + $0x2f8] ss:$0 sm:$0xff] }
0x15c9   :  { %v2500_v7 = vmul.f32 %v2488_v5, %v2488_v5  ;;  %v2494_v8 = vpop.xlane.xlu0 %2493  ;;  %v2504_v17 = vsub.f32 %v4942_v37, %v2488_v5 }
0x15ca   :  { %v2498_v9 = vmul.f32 0.03125, %v2494_v8  ;;  %v2497_v44 = vpop.xlane.xlu1 %2496  ;;  %v3026_v8 = vld [vmem:[%s5073_s3 + $0x300] ss:$0 sm:$0xff] }
0x15cb   :  { %v2499_v11 = vmul.f32 0.03125, %v2497_v44 }
0x15cc   :  { %v2502_v12 = vsub.f32 %v2498_v9, %v2500_v7 }
0x15cd   :  { %v2503_v13 = vsub.f32 %v2499_v11, %v2501_v10 }
0x15ce   :  { %v2506_v57 = vadd.f32 1e-05, %v2502_v12 }
0x15cf   :  { %v2507_v14 = vadd.f32 1e-05, %v2503_v13 }
0x15d0   :  { %4104 = vrsqrt.f32 %v2506_v57 }
0x15d1   :  { %4106 = vrsqrt.f32 %v2507_v14 }
0x15da   :  { %v4105_v16 = vpop.eup %4104 }
0x15db   :  { %v4107_v36 = vpop.eup %4106  ;;  %v2510_v20 = vmul.f32 %v4105_v16, %v2504_v17 }
0x15dc   :  { %v2511_v21 = vmul.f32 %v4107_v36, %v2505_v18  ;;  %v2805_v36 = vld [vmem:[%s5073_s3 + $0x320] sm:$0xff] }
0x15dd   :  { %v2517_v28 = vmul.f32 %v3019_v19, %v2510_v20  ;;  %v2806_v20 = vld [vmem:[%s5073_s3 + $0x328] sm:$0xff] }
0x15de   :  { %v2518_v29 = vmul.f32 %v3019_v19, %v2511_v21  ;;  %v2804_v19 = vld [vmem:[%s5073_s3 + $0x318] sm:$0xff] }
0x15df   :  { %v2524_v26 = vadd.f32 %v3020_v23, %v2517_v28  ;;  %v3861_v21 = vpack.c.bf16 %v2805_v36, %v2804_v19 }
0x15e0   :  { %v2525_v40 = vadd.f32 %v3020_v23, %v2518_v29  ;;  %v2807_v23 = vld [vmem:[%s5073_s3 + $0x330] sm:$0xff] }
0x15e1   :  { %3548 = vmatprep.mubr.msk.f32.mxu1 %vm171_vm2, %v2524_v26  ;;  %v3865_v28 = vpack.c.bf16 %v2807_v23, %v2806_v20  ;;  %3862 = vmatprep.subr.bf16.mxu1 %v3861_v21 }
0x15e2   :  { %3549 = vmatmul.mubr.msk.f32.vlgmr.msra.gmra.mrb[36].mxu1 %vm171_vm2, %v2525_v40 }
0x15e3   :  { %3864 = vmatpush3.bf16.msra.mxu1 %v3861_v21 }
0x15e4   :  { %3866 = vmatprep.subr.bf16.mxu1 %v3865_v28 }
0x15e7   :  { %3868 = vmatpush3.bf16.msra.mxu1 %v3865_v28 }
0x16b5   :  { %v3550_v37 = vpop.f32.mrb[36].mxu1 }
0x16b6   :  { %v2613_v33 = vadd.f32 %v3550_v37, %v3021_v32  ;;  %v2607_v34 = vpop.f32.mrb[37].mxu1 }
0x16b7   :  { %v2608_v35 = vadd.f32 %v3021_v32, %v2607_v34 }
0x16b8   :  { %v2617_v47 = vmax.f32 %v2613_v33, 0.0 }
0x16b9   :  { %v2616_v22 = vmax.f32 %v2608_v35, 0.0 }
0x16bb   :  { %3583 = vmatprep.mubr.f32.mxu0 %v2616_v22 }
0x16bc   :  { %3584 = vmatmul.mubr.f32.vlgmr.msra.gmra.mrb[34].mxu0 %v2617_v47 }
0x178f   :  { %v3585_v38 = vpop.f32.mrb[34].mxu0 }
0x1790   :  { %v2711_v39 = vadd.f32 %v3585_v38, %v3024_v46  ;;  %v2705_v50 = vpop.f32.mrb[35].mxu0 }
0x1791   :  { %v2706_v41 = vadd.f32 %v3024_v46, %v2705_v50 }
0x1792   :  { %v2715_v56 = vadd.f32 %v2711_v39, %v2525_v40 }
0x1793   :  { %v2714_v58 = vadd.f32 %v2706_v41, %v2524_v26  ;;  %v3027_v41 = vld [vmem:[%s5073_s3 + $0x308] ss:$0 sm:$0xff] }
0x1794   :  { %v2719_v45 = vsel %vm171_vm2, %v2715_v56, 0.0  ;;  %v2725_v42 = vmul.f32 %v2715_v56, %v2715_v56 }
0x1795   :  { %2720 = vadd.xlane.f32.xlu1 %v2719_v45  ;;  %v2716_v43 = vsel %vm171_vm2, %v2714_v58, 0.0  ;;  %v2724_v49 = vmul.f32 %v2714_v58, %v2714_v58 }
0x1796   :  { %2717 = vadd.xlane.f32.xlu0 %v2716_v43  ;;  %v2729_v31 = vsel %vm171_vm2, %v2725_v42, 0.0  ;;  %v3028_v43 = vld [vmem:[%s5073_s3 + $0x310] ss:$0 sm:$0xff] }
0x1797   :  { %v2726_v48 = vsel %vm171_vm2, %v2724_v49, 0.0 }
0x1799   :  { %2730 = vadd.xlane.f32.xlu1 %v2729_v31 }
0x179a   :  { %2727 = vadd.xlane.f32.xlu0 %v2726_v48 }
0x1822   :  { %v2721_v15 = vpop.xlane.xlu1 %2720 }
0x1823   :  { %v2723_v51 = vmul.f32 0.03125, %v2721_v15  ;;  %v2718_v52 = vpop.xlane.xlu0 %2717  ;;  %v3029_v15 = vld [vmem:[%s5073_s3 + $0x338] ss:$0 sm:$0xff] }
0x1824   :  { %v2722_v53 = vmul.f32 0.03125, %v2718_v52 }
0x1825   :  { %v2735_v55 = vmul.f32 %v2723_v51, %v2723_v51  ;;  %v2739_v0 = vsub.f32 %v2715_v56, %v2723_v51 }
0x1826   :  { %v2731_v54 = vpop.xlane.xlu1 %2730  ;;  %v2734_v61 = vmul.f32 %v2722_v53, %v2722_v53  ;;  %v2738_v2 = vsub.f32 %v2714_v58, %v2722_v53 }
0x1827   :  { %v2733_v3 = vmul.f32 0.03125, %v2731_v54  ;;  %v2728_v59 = vpop.xlane.xlu0 %2727 }
0x1828   :  { %v2732_v6 = vmul.f32 0.03125, %v2728_v59 }
0x1829   :  { %v2737_v27 = vsub.f32 %v2733_v3, %v2735_v55 }
0x182a   :  { %v2736_v62 = vsub.f32 %v2732_v6, %v2734_v61 }
0x182b   :  { %v2741_v63 = vadd.f32 1e-05, %v2737_v27 }
0x182c   :  { %v2740_v60 = vadd.f32 1e-05, %v2736_v62 }
0x182d   :  { %4108 = vrsqrt.f32 %v2741_v63 }
0x182e   :  { %4110 = vrsqrt.f32 %v2740_v60 }
0x1837   :  { %v4109_v1 = vpop.eup %4108 }
0x1838   :  { %v4111_v5 = vpop.eup %4110  ;;  %v2745_v7 = vmul.f32 %v4109_v1, %v2739_v0 }
0x1839   :  { %v2744_v9 = vmul.f32 %v4111_v5, %v2738_v2 }
0x183a   :  { %v2752_v44 = vmul.f32 %v3025_v4, %v2745_v7 }
0x183b   :  { %v2751_v10 = vmul.f32 %v3025_v4, %v2744_v9 }
0x183c   :  { %v2759_v11 = vadd.f32 %v3026_v8, %v2752_v44 }
0x183d   :  { %v2758_v12 = vadd.f32 %v3026_v8, %v2751_v10 }
0x183e   :  { %v2763_v13 = vsel %vm171_vm2, %v2759_v11, 0.0  ;;  %v2769_v57 = vmul.f32 %v2759_v11, %v2759_v11 }
0x183f   :  { %2764 = vadd.xlane.f32.xlu1 %v2763_v13  ;;  %v2760_v14 = vsel %vm171_vm2, %v2758_v12, 0.0  ;;  %v2768_v17 = vmul.f32 %v2758_v12, %v2758_v12 }
0x1840   :  { %2761 = vadd.xlane.f32.xlu0 %v2760_v14  ;;  %v2773_v16 = vsel %vm171_vm2, %v2769_v57, 0.0 }
0x1841   :  { %v2770_v18 = vsel %vm171_vm2, %v2768_v17, 0.0 }
0x1843   :  { %2774 = vadd.xlane.f32.xlu1 %v2773_v16 }
0x1844   :  { %2771 = vadd.xlane.f32.xlu0 %v2770_v18 }
0x18cc   :  { %v2765_v29 = vpop.xlane.xlu1 %2764 }
0x18cd   :  { %v2767_v26 = vmul.f32 0.03125, %v2765_v29  ;;  %v2762_v40 = vpop.xlane.xlu0 %2761 }
0x18ce   :  { %v2766_v30 = vmul.f32 0.03125, %v2762_v40 }
0x18cf   :  { %v2779_v24 = vmul.f32 %v2767_v26, %v2767_v26  ;;  %v2783_v38 = vsub.f32 %v2759_v11, %v2767_v26 }
0x18d0   :  { %v2775_v25 = vpop.xlane.xlu1 %2774  ;;  %v2778_v33 = vmul.f32 %v2766_v30, %v2766_v30  ;;  %v2782_v50 = vsub.f32 %v2758_v12, %v2766_v30 }
0x18d1   :  { %v2777_v32 = vmul.f32 0.03125, %v2775_v25  ;;  %v2772_v37 = vpop.xlane.xlu0 %2771 }
0x18d2   :  { %v2776_v34 = vmul.f32 0.03125, %v2772_v37 }
0x18d3   :  { %v2781_v35 = vsub.f32 %v2777_v32, %v2779_v24 }
0x18d4   :  { %v2780_v22 = vsub.f32 %v2776_v34, %v2778_v33 }
0x18d5   :  { %v2785_v47 = vadd.f32 1e-05, %v2781_v35 }
0x18d6   :  { %v2784_v46 = vadd.f32 1e-05, %v2780_v22 }
0x18d7   :  { %4112 = vrsqrt.f32 %v2785_v47 }
0x18d8   :  { %4114 = vrsqrt.f32 %v2784_v46 }
0x18e1   :  { %v4113_v39 = vpop.eup %4112 }
0x18e2   :  { %v4115_v56 = vpop.eup %4114  ;;  %v2789_v58 = vmul.f32 %v4113_v39, %v2783_v38 }
0x18e3   :  { %v2788_v45 = vmul.f32 %v4115_v56, %v2782_v50 }
0x18e4   :  { %v2796_v42 = vmul.f32 %v3027_v41, %v2789_v58 }
0x18e5   :  { %v2795_v49 = vmul.f32 %v3027_v41, %v2788_v45 }
0x18e6   :  { %v2803_v48 = vadd.f32 %v3028_v43, %v2796_v42 }
0x18e7   :  { %v2802_v31 = vadd.f32 %v3028_v43, %v2795_v49 }
0x18e9   :  { %3594 = vmatprep.mubr.msk.f32.mxu1 %vm171_vm2, %v2802_v31 }
0x18ea   :  { %3595 = vmatmul.mubr.msk.f32.vlgmr.msra.gmra.mrb[38].mxu1 %vm171_vm2, %v2803_v48 }
0x19bd   :  { %v3596_v51 = vpop.f32.mrb[38].mxu1 }
0x19be   :  { %v2891_v52 = vadd.f32 %v3596_v51, %v3029_v15  ;;  %v2885_v53 = vpop.f32.mrb[39].mxu1 }
0x19bf   :  { %v2886_v54 = vadd.f32 %v3029_v15, %v2885_v53 }
0x19c0   :  { %2895 = vst [vmem:[%s5077_s4 + $0x8] sm:$0xff] %v2891_v52 }
0x19c1   :  { %2894 = vst [vmem:[%s5077_s4] sm:$0xff] %v2886_v54 }

</bundles_post_ra>
